<compile_context>
chip_gen: v5e
topology: v5e:2x2
jax: 0.10.0
libtpu: 0.0.40
codegen_flags: <defaults>
</compile_context>

<pallas_src>
import math

import jax
import jax.numpy as jnp
from jax.experimental import pallas as pl
from jax.experimental.pallas import tpu as pltpu

LOG_2PI = math.log(2.0 * math.pi)

_H = _W = 7      # MiniGrid obs image spatial size
_C_IN = 3
_N_STAT = 5      # [mean, std, numel, COMP, l_nml] per MDL layer


# --------------------------------------------------------------------------------------
# In-kernel MDL block: getHistoryStats (history=None branch) + getMDL(RN=True)
# --------------------------------------------------------------------------------------

def _mdl(x):
    n = float(x.size)
    mu = jnp.mean(x)
    d = x - mu
    d2 = d * d                                    # reused for var and logp
    var = jnp.sum(d2) * (1.0 / (n - 1.0))         # torch.std -> unbiased (n-1)
    # NOTE: for the critic fc2 layer n == B, so B == 1 divides by zero (matches torch NaN).
    sigma = jnp.sqrt(var)                         # only needed for the returned stats
    inv_var = 1.0 / var
    # log N(x | mu, sigma) = -0.5*d2/var + const ; keep the scalar constant off the tile
    t = -0.5 * inv_var * d2
    const = -0.5 * jnp.log(var) - 0.5 * LOG_2PI
    t_max = jnp.max(t)
    logp_max = t_max + const
    e = jnp.exp(t - t_max)                        # == exp(logp - logp_max), one exp pass
    s = jnp.sum(e)
    sum_p = logp_max + jnp.log(s)
    comp0 = 0.0                                   # x_history_stack is None
    # sum(exp(logp - comp0)) == s * exp(logp_max - comp0) -> reuse s in both branches
    comp_a = comp0 + jnp.log(1.0 + s * jnp.exp(logp_max - comp0))
    comp_b = logp_max + jnp.log(jnp.exp(comp0 - logp_max) + s)
    comp_new = jnp.where(logp_max < comp0, comp_a, comp_b)   # torch: if COMP_max > logp_max
    l_nml = comp_new - sum_p
    return l_nml * x, (mu, sigma, jnp.float32(n), comp_new, l_nml)   # RN=True: x = l_nml*x


# --------------------------------------------------------------------------------------
# Fused forward kernel (conv trunk + both heads + MDL reweighting)
# --------------------------------------------------------------------------------------

def _fused_forward_kernel(patches_ref, w1_ref, b1_ref, w2_ref, b2_ref, w3_ref, b3_ref,
                          wh1_ref, bh1_ref, wa2_ref, ba2_ref, wc2_ref, bc2_ref,
                          out_ref, stats_ref, y1_ref, pool_ref):
    B = patches_ref.shape[0] // 6
    n_act = wa2_ref.shape[1]

    # ---- conv1 (3->16, 2x2) as one matmul with a banded weight; output layout:
    #      rows = b*6 + h (h in 0..5), lanes = w*16 + c (w in 0..5) -> (B*6, 96) ----
    y1 = jnp.dot(patches_ref[...], w1_ref[...], preferred_element_type=jnp.float32)
    y1_ref[...] = jnp.maximum(y1 + b1_ref[...], 0.0)          # single representation

    # ---- 2x2 max-pool (6x6 -> 3x3), batch-vectorized ----
    # h-pool: row index b*6+h has parity == parity(h), so even/odd rows are one stride-2
    # read each; w-pool: three static 16-lane slices.
    even = y1_ref[pl.ds(0, 3 * B, stride=2), :]               # (B*3, 96), h = 2*ph
    odd = y1_ref[pl.ds(1, 3 * B, stride=2), :]                # (B*3, 96), h = 2*ph+1
    yh = jnp.maximum(even, odd)                               # rows = b*3 + ph
    pool_ref[...] = jnp.concatenate(
        [jnp.maximum(yh[:, 32 * pw:32 * pw + 16], yh[:, 32 * pw + 16:32 * pw + 32])
         for pw in range(3)], axis=1)                         # (B*3, 48), lanes = pw*16+c

    # ---- conv2 (16->32, 2x2): rows ordered (h2, b) via four stride-3 reads; banded
    #      (96, 64) weight produces lanes = w2*32 + c2 ----
    taps = []
    for dh in range(2):
        taps.append(jnp.concatenate(
            [pool_ref[pl.ds(h2 + dh, B, stride=3), :] for h2 in range(2)], axis=0))
    lhs2 = jnp.concatenate(taps, axis=1)                      # (2B, 96)
    y2 = jnp.maximum(
        jnp.dot(lhs2, w2_ref[...], preferred_element_type=jnp.float32) + b2_ref[...],
        0.0)                                                  # (2B, 64), rows = h2*B + b

    # ---- conv3 (32->64, 2x2 over 2x2 -> 1x1): lanes = kh*64 + kw*32 + ci ----
    p3 = jnp.concatenate([y2[0:B, :], y2[B:2 * B, :]], axis=1)          # (B, 128)
    emb = jnp.maximum(
        jnp.dot(p3, w3_ref[...], preferred_element_type=jnp.float32) + b3_ref[...],
        0.0)                                                  # (B, 64) == NCHW flatten

    # ---- fused actor_fc1 | critic_fc1: one (B,64)x(64,128) matmul, slice lanes ----
    h = jnp.dot(emb, wh1_ref[...], preferred_element_type=jnp.float32) + bh1_ref[...]
    a, s0 = _mdl(h[:, :64])         # actor fc1  (MDL layer 0)
    c, s2 = _mdl(h[:, 64:128])      # critic fc1 (MDL layer 2)

    # ---- actor head ----
    a = jnp.tanh(a)
    a = jnp.dot(a, wa2_ref[...], preferred_element_type=jnp.float32) + ba2_ref[...]
    a, s1 = _mdl(a)                 # MDL layer 1, (B, n_act)
    # torch NaN guard: ones(x.shape)/sum(ones(x.shape)) == 1/B everywhere
    # (python sum() reduces over dim 0 only, giving a (n_actions,) tensor of value B).
    has_nan = jnp.sum(jnp.where(a != a, 1.0, 0.0)) > 0.0
    a = jnp.where(has_nan, jnp.float32(1.0 / B), a)
    m = jnp.max(a, axis=1, keepdims=True)
    z = a - m
    logp = z - jnp.log(jnp.sum(jnp.exp(z), axis=1, keepdims=True))      # log_softmax

    # ---- critic head ----
    c = jnp.tanh(c)
    c = jnp.dot(c, wc2_ref[...], preferred_element_type=jnp.float32) + bc2_ref[...]
    c, s3 = _mdl(c)                 # MDL layer 3, (B, 1)

    # ---- outputs: one lane-dense (B,128) store + scalar MDL stats into SMEM ----
    out_ref[...] = jnp.concatenate(
        [logp, c, jnp.zeros((B, 128 - n_act - 1), jnp.float32)], axis=1)
    for row, st in enumerate((s0, s1, s2, s3)):               # [mean,std,numel,COMP,l]
        for col, v in enumerate(st):
            stats_ref[row, col] = v


# --------------------------------------------------------------------------------------
# Wrapper
# --------------------------------------------------------------------------------------

def _full_spec(shape):
    return pl.BlockSpec(shape, lambda: tuple(0 for _ in shape))


def _hwio(w):   # OIHW -> (kh, kw, ci, co)
    return jnp.transpose(w, (2, 3, 1, 0))


def _banded_conv1_weight(w):        # (2,2,3,16) OIHW -> (42, 96)
    wh = _hwio(w)
    big = jnp.zeros((2 * _W * _C_IN, 6 * 16), jnp.float32)
    for dh in range(2):
        for dw in range(2):
            for wo in range(6):
                r = dh * (_W * _C_IN) + (wo + dw) * _C_IN
                big = big.at[r:r + _C_IN, wo * 16:(wo + 1) * 16].set(wh[dh, dw])
    return big


def _banded_conv2_weight(w):        # (32,16,2,2) OIHW -> (96, 64)
    wh = _hwio(w)
    big = jnp.zeros((2 * 3 * 16, 2 * 32), jnp.float32)
    for dh in range(2):
        for dw in range(2):
            for wo in range(2):
                r = dh * 48 + (wo + dw) * 16
                big = big.at[r:r + 16, wo * 32:(wo + 1) * 32].set(wh[dh, dw])
    return big


def ac_model_rn_forward(obs_image, memory, params, n_actions):
    """Returns (dist_log_probs, value, memory, x_history_new, COMP_new, l_new)."""
    B, H, W, C = obs_image.shape
    assert (H, W, C) == (_H, _W, _C_IN), "kernel is specialized to the (7,7,3) MiniGrid obs"
    assert n_actions <= 120

    # conv1 row-pair patches: rows = (b, h_out), lanes = [img[b,h], img[b,h+1]] -> 42 lanes.
    top = obs_image[:, 0:6].reshape(B, 6, _W * _C_IN)
    bot = obs_image[:, 1:7].reshape(B, 6, _W * _C_IN)
    patches = jnp.concatenate([top, bot], axis=-1).reshape(B * 6, 2 * _W * _C_IN)

    w1b = _banded_conv1_weight(params["conv1_w"])
    b1b = jnp.tile(params["conv1_b"], 6).reshape(1, 96)
    w2b = _banded_conv2_weight(params["conv2_w"])
    b2b = jnp.tile(params["conv2_b"], 2).reshape(1, 64)
    w3f = _hwio(params["conv3_w"]).reshape(4 * 32, 64)
    b3 = params["conv3_b"].reshape(1, 64)
    # fused actor/critic fc1 (lanes 0:64 = actor, 64:128 = critic)
    wh1 = jnp.concatenate([params["actor_fc1_w"].T, params["critic_fc1_w"].T], axis=1)
    bh1 = jnp.concatenate([params["actor_fc1_b"], params["critic_fc1_b"]]).reshape(1, 128)
    wa2, ba2 = params["actor_fc2_w"].T, params["actor_fc2_b"].reshape(1, -1)
    wc2, bc2 = params["critic_fc2_w"].T, params["critic_fc2_b"].reshape(1, -1)

    args = (patches, w1b, b1b, w2b, b2b, w3f, b3, wh1, bh1, wa2, ba2, wc2, bc2)

    flops = 2 * B * (6 * 42 * 96 + 2 * 96 * 64 + 128 * 64 + 64 * 128 + 64 * n_actions + 64)
    transc = B * (6 * 64 + 3 * n_actions + 3) + 64
    bytes_acc = 4 * (sum(int(a.size) for a in args) + B * 128 + 4 * _N_STAT)
    vmem_limit = int(min(64 * 1024 * 1024, 8 * 1024 * 1024 + 64 * 1024 * B))

    # No grid: MDL stats are full-batch reductions, so batch sharding would change semantics.
    # TODO(synk): batch-gridded conv trunk (dimension_semantics=("parallel",)) + tiny
    # full-batch heads kernel for v7x dual-TensorCore / very large B.
    main, stats = pl.pallas_call(
        _fused_forward_kernel,
        out_shape=(jax.ShapeDtypeStruct((B, 128), jnp.float32),
                   jax.ShapeDtypeStruct((4, _N_STAT), jnp.float32)),
        in_specs=[_full_spec(a.shape) for a in args],
        out_specs=(_full_spec((B, 128)),
                   pl.BlockSpec(memory_space=pltpu.MemorySpace.SMEM)),
        scratch_shapes=[pltpu.VMEM((6 * B, 96), jnp.float32),
                        pltpu.VMEM((3 * B, 48), jnp.float32)],
        compiler_params=pltpu.CompilerParams(vmem_limit_bytes=vmem_limit),
        cost_estimate=pl.CostEstimate(flops=int(flops), transcendentals=int(transc),
                                      bytes_accessed=int(bytes_acc)),
    )(*args)

    logits = main[:, :n_actions]
    value = main[:, n_actions]
    x_history_new = [[stats[l, 0], stats[l, 1], stats[l, 2]] for l in range(4)]
    COMP_new = [stats[l, 3] for l in range(4)]
    l_new = [stats[l, 4] for l in range(4)]
    # use_memory=False: memory is returned unchanged (LSTM branch not taken).
    # TODO(synk): optional LSTMCell / text-GRU branches (use_memory/use_text) not implemented.
    return logits, value, memory, x_history_new, COMP_new, l_new


# --------------------------------------------------------------------------------------
# Deterministic parameter init (shapes of ACModelRN.__init__; init_params rule applied
# to Linear layers: row-normalized normal(0,1) weights, zero bias).
# --------------------------------------------------------------------------------------

def init_model_params(key, n_actions=7):
    ks = jax.random.split(key, 10)

    def conv_init(kw, kb, cout, cin):
        w = 0.2 * jax.random.normal(kw, (cout, cin, 2, 2), jnp.float32)  # OIHW
        b = 0.05 * jax.random.normal(kb, (cout,), jnp.float32)
        return w, b

    def linear_init(kw, out_f, in_f):
        w = jax.random.normal(kw, (out_f, in_f), jnp.float32)
        w = w / jnp.sqrt(jnp.sum(w ** 2, axis=1, keepdims=True))
        b = jnp.zeros((out_f,), jnp.float32)
        return w, b

    p = {}
    p["conv1_w"], p["conv1_b"] = conv_init(ks[0], ks[1], 16, 3)
    p["conv2_w"], p["conv2_b"] = conv_init(ks[2], ks[3], 32, 16)
    p["conv3_w"], p["conv3_b"] = conv_init(ks[4], ks[5], 64, 32)
    emb = 64  # ((7-1)//2 - 2) * ((7-1)//2 - 2) * 64
    p["actor_fc1_w"], p["actor_fc1_b"] = linear_init(ks[6], 64, emb)
    p["actor_fc2_w"], p["actor_fc2_b"] = linear_init(ks[7], n_actions, 64)
    p["critic_fc1_w"], p["critic_fc1_b"] = linear_init(ks[8], 64, emb)
    p["critic_fc2_w"], p["critic_fc2_b"] = linear_init(ks[9], 1, 64)
    return p


# --------------------------------------------------------------------------------------
# Pure-JAX (non-Pallas) reference of ACModelRN.forward for numerical validation.
# --------------------------------------------------------------------------------------

def _reference_forward(obs_image, params, n_actions):
    hp = jax.lax.Precision.HIGHEST
    B = obs_image.shape[0]

    def conv(x, w, b):
        y = jax.lax.conv_general_dilated(
            x, w, window_strides=(1, 1), padding="VALID",
            dimension_numbers=("NHWC", "OIHW", "NHWC"), precision=hp)
        return jax.nn.relu(y + b)

    y = conv(obs_image, params["conv1_w"], params["conv1_b"])
    y = jax.lax.reduce_window(y, -jnp.inf, jax.lax.max,
                              (1, 2, 2, 1), (1, 2, 2, 1), "VALID")
    y = conv(y, params["conv2_w"], params["conv2_b"])
    y = conv(y, params["conv3_w"], params["conv3_b"])
    emb = y.reshape(B, -1)                      # (B,1,1,64) -> (B,64) (== NCHW flatten)

    def mdl(x):
        mu = jnp.mean(x)
        sigma = jnp.std(x, ddof=1)
        logp = -0.5 * ((x - mu) / sigma) ** 2 - jnp.log(sigma) - 0.5 * LOG_2PI
        lmax = jnp.max(logp)
        sum_p = lmax + jnp.log(jnp.sum(jnp.exp(logp - lmax)))
        comp0 = jnp.float32(0.0)
        comp = jnp.where(
            comp0 > lmax,
            comp0 + jnp.log(1.0 + jnp.sum(jnp.exp(logp - comp0))),
            lmax + jnp.log(jnp.exp(comp0 - lmax) + jnp.sum(jnp.exp(logp - lmax))))
        l = comp - sum_p
        return l * x, (mu, sigma, float(x.size), comp, l)

    def lin(x, w, b):
        return jnp.dot(x, w.T, precision=hp) + b

    a = lin(emb, params["actor_fc1_w"], params["actor_fc1_b"])
    a, s0 = mdl(a)
    a = jnp.tanh(a)
    a = lin(a, params["actor_fc2_w"], params["actor_fc2_b"])
    a, s1 = mdl(a)
    a = jnp.where(jnp.sum(jnp.where(a != a, 1.0, 0.0)) > 0.0, jnp.float32(1.0 / B), a)
    logits = jax.nn.log_softmax(a, axis=1)

    c = lin(emb, params["critic_fc1_w"], params["critic_fc1_b"])
    c, s2 = mdl(c)
    c = jnp.tanh(c)
    c = lin(c, params["critic_fc2_w"], params["critic_fc2_b"])
    c, s3 = mdl(c)
    value = c[:, 0]

    stats = (s0, s1, s2, s3)
    return (logits, value, None,
            [[s[0], s[1], s[2]] for s in stats],
            [s[3] for s in stats],
            [s[4] for s in stats])


if __name__ == "__main__":
    key = jax.random.PRNGKey(0)
    k_obs, k_par = jax.random.split(key)
    B, n_actions = 2, 7
    obs_image = jax.random.uniform(k_obs, (B, _H, _W, _C_IN), jnp.float32, 0.0, 10.0)
    params = init_model_params(k_par, n_actions=n_actions)
    memory = jnp.zeros((B, 2 * 64), jnp.float32)  # memory_size = 2 * image_embedding_size

    fwd = jax.jit(ac_model_rn_forward, static_argnums=(3,))
    out = jax.block_until_ready(fwd(obs_image, memory, params, n_actions))
    logits, value = out[0], out[1]

    # structural checks
    assert logits.shape == (B, n_actions) and value.shape == (B,)
    assert bool(jnp.all(jnp.isfinite(logits))) and bool(jnp.all(jnp.isfinite(value)))
    assert bool(jnp.max(jnp.abs(jnp.sum(jnp.exp(logits), axis=1) - 1.0)) < 1e-3)

    # numerical check against the pure-JAX reference
    ref = _reference_forward(obs_image, params, n_actions)

    def _close(a, b, tol=3e-3):
        a = jnp.asarray(a, jnp.float32)
        b = jnp.asarray(b, jnp.float32)
        return bool(jnp.max(jnp.abs(a - b) / (1.0 + jnp.abs(b))) < tol)

    assert _close(logits, ref[0])
    assert _close(value, ref[1])
    for l in range(4):
        for j in range(3):
            assert _close(out[3][l][j], ref[3][l][j])   # [mean, std, numel]
        assert _close(out[4][l], ref[4][l])             # COMP
        assert _close(out[5][l], ref[5][l])             # l_nml
    print("KERNEL_OK")
</pallas_src>

<mosaic_0001>
module attributes {stable_mosaic.version = 11 : i64} {
  func.func @_fused_forward_kernel(%arg0: memref<12x42xf32, #tpu.memory_space<vmem>>, %arg1: memref<42x96xf32, #tpu.memory_space<vmem>>, %arg2: memref<1x96xf32, #tpu.memory_space<vmem>>, %arg3: memref<96x64xf32, #tpu.memory_space<vmem>>, %arg4: memref<1x64xf32, #tpu.memory_space<vmem>>, %arg5: memref<128x64xf32, #tpu.memory_space<vmem>>, %arg6: memref<1x64xf32, #tpu.memory_space<vmem>>, %arg7: memref<64x128xf32, #tpu.memory_space<vmem>>, %arg8: memref<1x128xf32, #tpu.memory_space<vmem>>, %arg9: memref<64x7xf32, #tpu.memory_space<vmem>>, %arg10: memref<1x7xf32, #tpu.memory_space<vmem>>, %arg11: memref<64x1xf32, #tpu.memory_space<vmem>>, %arg12: memref<1x1xf32, #tpu.memory_space<vmem>>, %arg13: memref<2x128xf32, #tpu.memory_space<vmem>>, %arg14: memref<4x5xf32, #tpu.memory_space<smem>>, %arg15: memref<12x96xf32, #tpu.memory_space<vmem>>, %arg16: memref<6x48xf32, #tpu.memory_space<vmem>>) attributes {dimension_semantics = [], scalar_prefetch = 0 : i64, scratch_operands = 2 : i64, tpu.core_type = #tpu.core_type<tc>} {
    %c0 = arith.constant 0 : index
    %c0_0 = arith.constant 0 : index
    %0 = vector.load %arg0[%c0, %c0_0] : memref<12x42xf32, #tpu.memory_space<vmem>>, vector<12x42xf32>
    %c0_1 = arith.constant 0 : index
    %c0_2 = arith.constant 0 : index
    %1 = vector.load %arg1[%c0_1, %c0_2] : memref<42x96xf32, #tpu.memory_space<vmem>>, vector<42x96xf32>
    %cst = arith.constant dense<0.000000e+00> : vector<12x96xf32>
    %2 = tpu.matmul %0, %1, %cst {dimension_numbers = #tpu.dot_dimension_numbers<[1], [0], [0], [1], [0, 0, 1, 1], [], []>} : vector<12x42xf32>, vector<42x96xf32>, vector<12x96xf32> -> vector<12x96xf32>
    %c0_3 = arith.constant 0 : index
    %c0_4 = arith.constant 0 : index
    %3 = vector.load %arg2[%c0_3, %c0_4] : memref<1x96xf32, #tpu.memory_space<vmem>>, vector<1x96xf32>
    %4 = vector.broadcast %3 : vector<1x96xf32> to vector<12x96xf32>
    %5 = arith.addf %2, %4 : vector<12x96xf32>
    %cst_5 = arith.constant 0.000000e+00 : f32
    %6 = vector.broadcast %cst_5 : f32 to vector<12x96xf32>
    %7 = arith.maximumf %5, %6 : vector<12x96xf32>
    %c0_6 = arith.constant 0 : index
    %c0_7 = arith.constant 0 : index
    %8 = vector.load %arg15[%c0_6, %c0_7] : memref<12x96xf32, #tpu.memory_space<vmem>>, vector<12x96xf32>
    tpu.vector_store %arg15[%c0_6, %c0_7], %7 {strides = array<i32>} : memref<12x96xf32, #tpu.memory_space<vmem>>, vector<12x96xf32>,
    %c0_8 = arith.constant 0 : index
    %c0_9 = arith.constant 0 : index
    %9 = tpu.strided_load %arg15[%c0_8, %c0_9] {strides = array<i32: 2, 1>} : memref<12x96xf32, #tpu.memory_space<vmem>>, vector<6x96xf32>
    %c1 = arith.constant 1 : index
    %c0_10 = arith.constant 0 : index
    %10 = tpu.strided_load %arg15[%c1, %c0_10] {strides = array<i32: 2, 1>} : memref<12x96xf32, #tpu.memory_space<vmem>>, vector<6x96xf32>
    %11 = arith.maximumf %9, %10 : vector<6x96xf32>
    %12 = vector.extract_strided_slice %11 {offsets = [0, 0], sizes = [6, 16], strides = [1, 1]} : vector<6x96xf32> to vector<6x16xf32>
    %13 = vector.extract_strided_slice %11 {offsets = [0, 16], sizes = [6, 16], strides = [1, 1]} : vector<6x96xf32> to vector<6x16xf32>
    %14 = arith.maximumf %12, %13 : vector<6x16xf32>
    %15 = vector.extract_strided_slice %11 {offsets = [0, 32], sizes = [6, 16], strides = [1, 1]} : vector<6x96xf32> to vector<6x16xf32>
    %16 = vector.extract_strided_slice %11 {offsets = [0, 48], sizes = [6, 16], strides = [1, 1]} : vector<6x96xf32> to vector<6x16xf32>
    %17 = arith.maximumf %15, %16 : vector<6x16xf32>
    %18 = vector.extract_strided_slice %11 {offsets = [0, 64], sizes = [6, 16], strides = [1, 1]} : vector<6x96xf32> to vector<6x16xf32>
    %19 = vector.extract_strided_slice %11 {offsets = [0, 80], sizes = [6, 16], strides = [1, 1]} : vector<6x96xf32> to vector<6x16xf32>
    %20 = arith.maximumf %18, %19 : vector<6x16xf32>
    %21 = tpu.concatenate %14, %17, %20 in 1 : vector<6x16xf32>, vector<6x16xf32>, vector<6x16xf32> -> vector<6x48xf32>
    %c0_11 = arith.constant 0 : index
    %c0_12 = arith.constant 0 : index
    %22 = vector.load %arg16[%c0_11, %c0_12] : memref<6x48xf32, #tpu.memory_space<vmem>>, vector<6x48xf32>
    tpu.vector_store %arg16[%c0_11, %c0_12], %21 {strides = array<i32>} : memref<6x48xf32, #tpu.memory_space<vmem>>, vector<6x48xf32>,
    %c0_13 = arith.constant 0 : index
    %c0_14 = arith.constant 0 : index
    %23 = tpu.strided_load %arg16[%c0_13, %c0_14] {strides = array<i32: 3, 1>} : memref<6x48xf32, #tpu.memory_space<vmem>>, vector<2x48xf32>
    %c1_15 = arith.constant 1 : index
    %c0_16 = arith.constant 0 : index
    %24 = tpu.strided_load %arg16[%c1_15, %c0_16] {strides = array<i32: 3, 1>} : memref<6x48xf32, #tpu.memory_space<vmem>>, vector<2x48xf32>
    %25 = tpu.concatenate %23, %24 in 0 : vector<2x48xf32>, vector<2x48xf32> -> vector<4x48xf32>
    %c1_17 = arith.constant 1 : index
    %c0_18 = arith.constant 0 : index
    %26 = tpu.strided_load %arg16[%c1_17, %c0_18] {strides = array<i32: 3, 1>} : memref<6x48xf32, #tpu.memory_space<vmem>>, vector<2x48xf32>
    %c2 = arith.constant 2 : index
    %c0_19 = arith.constant 0 : index
    %27 = tpu.strided_load %arg16[%c2, %c0_19] {strides = array<i32: 3, 1>} : memref<6x48xf32, #tpu.memory_space<vmem>>, vector<2x48xf32>
    %28 = tpu.concatenate %26, %27 in 0 : vector<2x48xf32>, vector<2x48xf32> -> vector<4x48xf32>
    %29 = tpu.concatenate %25, %28 in 1 : vector<4x48xf32>, vector<4x48xf32> -> vector<4x96xf32>
    %c0_20 = arith.constant 0 : index
    %c0_21 = arith.constant 0 : index
    %30 = vector.load %arg3[%c0_20, %c0_21] : memref<96x64xf32, #tpu.memory_space<vmem>>, vector<96x64xf32>
    %cst_22 = arith.constant dense<0.000000e+00> : vector<4x64xf32>
    %31 = tpu.matmul %29, %30, %cst_22 {dimension_numbers = #tpu.dot_dimension_numbers<[1], [0], [0], [1], [0, 0, 1, 1], [], []>} : vector<4x96xf32>, vector<96x64xf32>, vector<4x64xf32> -> vector<4x64xf32>
    %c0_23 = arith.constant 0 : index
    %c0_24 = arith.constant 0 : index
    %32 = vector.load %arg4[%c0_23, %c0_24] : memref<1x64xf32, #tpu.memory_space<vmem>>, vector<1x64xf32>
    %33 = vector.broadcast %32 : vector<1x64xf32> to vector<4x64xf32>
    %34 = arith.addf %31, %33 : vector<4x64xf32>
    %cst_25 = arith.constant 0.000000e+00 : f32
    %35 = vector.broadcast %cst_25 : f32 to vector<4x64xf32>
    %36 = arith.maximumf %34, %35 : vector<4x64xf32>
    %37 = vector.extract_strided_slice %36 {offsets = [0, 0], sizes = [2, 64], strides = [1, 1]} : vector<4x64xf32> to vector<2x64xf32>
    %38 = vector.extract_strided_slice %36 {offsets = [2, 0], sizes = [2, 64], strides = [1, 1]} : vector<4x64xf32> to vector<2x64xf32>
    %39 = tpu.concatenate %37, %38 in 1 : vector<2x64xf32>, vector<2x64xf32> -> vector<2x128xf32>
    %c0_26 = arith.constant 0 : index
    %c0_27 = arith.constant 0 : index
    %40 = vector.load %arg5[%c0_26, %c0_27] : memref<128x64xf32, #tpu.memory_space<vmem>>, vector<128x64xf32>
    %cst_28 = arith.constant dense<0.000000e+00> : vector<2x64xf32>
    %41 = tpu.matmul %39, %40, %cst_28 {dimension_numbers = #tpu.dot_dimension_numbers<[1], [0], [0], [1], [0, 0, 1, 1], [], []>} : vector<2x128xf32>, vector<128x64xf32>, vector<2x64xf32> -> vector<2x64xf32>
    %c0_29 = arith.constant 0 : index
    %c0_30 = arith.constant 0 : index
    %42 = vector.load %arg6[%c0_29, %c0_30] : memref<1x64xf32, #tpu.memory_space<vmem>>, vector<1x64xf32>
    %43 = vector.broadcast %42 : vector<1x64xf32> to vector<2x64xf32>
    %44 = arith.addf %41, %43 : vector<2x64xf32>
    %cst_31 = arith.constant 0.000000e+00 : f32
    %45 = vector.broadcast %cst_31 : f32 to vector<2x64xf32>
    %46 = arith.maximumf %44, %45 : vector<2x64xf32>
    %c0_32 = arith.constant 0 : index
    %c0_33 = arith.constant 0 : index
    %47 = vector.load %arg7[%c0_32, %c0_33] : memref<64x128xf32, #tpu.memory_space<vmem>>, vector<64x128xf32>
    %cst_34 = arith.constant dense<0.000000e+00> : vector<2x128xf32>
    %48 = tpu.matmul %46, %47, %cst_34 {dimension_numbers = #tpu.dot_dimension_numbers<[1], [0], [0], [1], [0, 0, 1, 1], [], []>} : vector<2x64xf32>, vector<64x128xf32>, vector<2x128xf32> -> vector<2x128xf32>
    %c0_35 = arith.constant 0 : index
    %c0_36 = arith.constant 0 : index
    %49 = vector.load %arg8[%c0_35, %c0_36] : memref<1x128xf32, #tpu.memory_space<vmem>>, vector<1x128xf32>
    %50 = vector.broadcast %49 : vector<1x128xf32> to vector<2x128xf32>
    %51 = arith.addf %48, %50 : vector<2x128xf32>
    %52 = vector.extract_strided_slice %51 {offsets = [0, 0], sizes = [2, 64], strides = [1, 1]} : vector<2x128xf32> to vector<2x64xf32>
    %53 = vector.shape_cast %52 : vector<2x64xf32> to vector<1x2x64xf32>
    %cst_37 = arith.constant dense<0.000000e+00> : vector<1xf32>
    %54 = vector.multi_reduction <add>, %53, %cst_37 [1, 2] : vector<1x2x64xf32> to vector<1xf32>
    %55 = vector.shape_cast %54 : vector<1xf32> to vector<1x1x1xf32>
    %56 = vector.extract %55[0, 0, 0] : f32 from vector<1x1x1xf32>
    %cst_38 = arith.constant 1.280000e+02 : f32
    %57 = arith.divf %56, %cst_38 : f32
    %58 = vector.broadcast %57 : f32 to vector<2x64xf32>
    %59 = arith.subf %52, %58 : vector<2x64xf32>
    %60 = arith.mulf %59, %59 : vector<2x64xf32>
    %61 = vector.shape_cast %60 : vector<2x64xf32> to vector<1x2x64xf32>
    %cst_39 = arith.constant dense<0.000000e+00> : vector<1xf32>
    %62 = vector.multi_reduction <add>, %61, %cst_39 [1, 2] : vector<1x2x64xf32> to vector<1xf32>
    %63 = vector.shape_cast %62 : vector<1xf32> to vector<1x1x1xf32>
    %64 = vector.extract %63[0, 0, 0] : f32 from vector<1x1x1xf32>
    %cst_40 = arith.constant 0.00787401571 : f32
    %65 = arith.mulf %64, %cst_40 : f32
    %66 = math.sqrt %65 : f32
    %cst_41 = arith.constant 1.000000e+00 : f32
    %67 = arith.divf %cst_41, %65 : f32
    %cst_42 = arith.constant -5.000000e-01 : f32
    %68 = arith.mulf %cst_42, %67 : f32
    %69 = vector.broadcast %68 : f32 to vector<2x64xf32>
    %70 = arith.mulf %69, %60 : vector<2x64xf32>
    %71 = math.log %65 : f32
    %cst_43 = arith.constant -5.000000e-01 : f32
    %72 = arith.mulf %cst_43, %71 : f32
    %cst_44 = arith.constant 0.918938517 : f32
    %73 = arith.subf %72, %cst_44 : f32
    %74 = vector.shape_cast %70 : vector<2x64xf32> to vector<1x2x64xf32>
    %cst_45 = arith.constant dense<0xFF800000> : vector<1xf32>
    %75 = vector.multi_reduction <maximumf>, %74, %cst_45 [1, 2] : vector<1x2x64xf32> to vector<1xf32>
    %76 = vector.shape_cast %75 : vector<1xf32> to vector<1x1x1xf32>
    %77 = vector.extract %76[0, 0, 0] : f32 from vector<1x1x1xf32>
    %78 = arith.addf %77, %73 : f32
    %79 = vector.broadcast %77 : f32 to vector<2x64xf32>
    %80 = arith.subf %70, %79 : vector<2x64xf32>
    %81 = math.exp %80 : vector<2x64xf32>
    %82 = vector.shape_cast %81 : vector<2x64xf32> to vector<1x2x64xf32>
    %cst_46 = arith.constant dense<0.000000e+00> : vector<1xf32>
    %83 = vector.multi_reduction <add>, %82, %cst_46 [1, 2] : vector<1x2x64xf32> to vector<1xf32>
    %84 = vector.shape_cast %83 : vector<1xf32> to vector<1x1x1xf32>
    %85 = vector.extract %84[0, 0, 0] : f32 from vector<1x1x1xf32>
    %86 = math.log %85 : f32
    %87 = arith.addf %78, %86 : f32
    %cst_47 = arith.constant 0.000000e+00 : f32
    %88 = arith.subf %78, %cst_47 : f32
    %89 = math.exp %88 : f32
    %90 = arith.mulf %85, %89 : f32
    %cst_48 = arith.constant 1.000000e+00 : f32
    %91 = arith.addf %cst_48, %90 : f32
    %92 = math.log %91 : f32
    %cst_49 = arith.constant 0.000000e+00 : f32
    %93 = arith.addf %cst_49, %92 : f32
    %cst_50 = arith.constant 0.000000e+00 : f32
    %94 = arith.subf %cst_50, %78 : f32
    %95 = math.exp %94 : f32
    %96 = arith.addf %95, %85 : f32
    %97 = math.log %96 : f32
    %98 = arith.addf %78, %97 : f32
    %cst_51 = arith.constant 0.000000e+00 : f32
    %99 = arith.cmpf olt, %78, %cst_51 : f32
    %100 = arith.select %99, %93, %98 : f32
    %101 = arith.subf %100, %87 : f32
    %102 = vector.broadcast %101 : f32 to vector<2x64xf32>
    %103 = arith.mulf %102, %52 : vector<2x64xf32>
    %104 = vector.extract_strided_slice %51 {offsets = [0, 64], sizes = [2, 64], strides = [1, 1]} : vector<2x128xf32> to vector<2x64xf32>
    %105 = vector.shape_cast %104 : vector<2x64xf32> to vector<1x2x64xf32>
    %cst_52 = arith.constant dense<0.000000e+00> : vector<1xf32>
    %106 = vector.multi_reduction <add>, %105, %cst_52 [1, 2] : vector<1x2x64xf32> to vector<1xf32>
    %107 = vector.shape_cast %106 : vector<1xf32> to vector<1x1x1xf32>
    %108 = vector.extract %107[0, 0, 0] : f32 from vector<1x1x1xf32>
    %cst_53 = arith.constant 1.280000e+02 : f32
    %109 = arith.divf %108, %cst_53 : f32
    %110 = vector.broadcast %109 : f32 to vector<2x64xf32>
    %111 = arith.subf %104, %110 : vector<2x64xf32>
    %112 = arith.mulf %111, %111 : vector<2x64xf32>
    %113 = vector.shape_cast %112 : vector<2x64xf32> to vector<1x2x64xf32>
    %cst_54 = arith.constant dense<0.000000e+00> : vector<1xf32>
    %114 = vector.multi_reduction <add>, %113, %cst_54 [1, 2] : vector<1x2x64xf32> to vector<1xf32>
    %115 = vector.shape_cast %114 : vector<1xf32> to vector<1x1x1xf32>
    %116 = vector.extract %115[0, 0, 0] : f32 from vector<1x1x1xf32>
    %cst_55 = arith.constant 0.00787401571 : f32
    %117 = arith.mulf %116, %cst_55 : f32
    %118 = math.sqrt %117 : f32
    %cst_56 = arith.constant 1.000000e+00 : f32
    %119 = arith.divf %cst_56, %117 : f32
    %cst_57 = arith.constant -5.000000e-01 : f32
    %120 = arith.mulf %cst_57, %119 : f32
    %121 = vector.broadcast %120 : f32 to vector<2x64xf32>
    %122 = arith.mulf %121, %112 : vector<2x64xf32>
    %123 = math.log %117 : f32
    %cst_58 = arith.constant -5.000000e-01 : f32
    %124 = arith.mulf %cst_58, %123 : f32
    %cst_59 = arith.constant 0.918938517 : f32
    %125 = arith.subf %124, %cst_59 : f32
    %126 = vector.shape_cast %122 : vector<2x64xf32> to vector<1x2x64xf32>
    %cst_60 = arith.constant dense<0xFF800000> : vector<1xf32>
    %127 = vector.multi_reduction <maximumf>, %126, %cst_60 [1, 2] : vector<1x2x64xf32> to vector<1xf32>
    %128 = vector.shape_cast %127 : vector<1xf32> to vector<1x1x1xf32>
    %129 = vector.extract %128[0, 0, 0] : f32 from vector<1x1x1xf32>
    %130 = arith.addf %129, %125 : f32
    %131 = vector.broadcast %129 : f32 to vector<2x64xf32>
    %132 = arith.subf %122, %131 : vector<2x64xf32>
    %133 = math.exp %132 : vector<2x64xf32>
    %134 = vector.shape_cast %133 : vector<2x64xf32> to vector<1x2x64xf32>
    %cst_61 = arith.constant dense<0.000000e+00> : vector<1xf32>
    %135 = vector.multi_reduction <add>, %134, %cst_61 [1, 2] : vector<1x2x64xf32> to vector<1xf32>
    %136 = vector.shape_cast %135 : vector<1xf32> to vector<1x1x1xf32>
    %137 = vector.extract %136[0, 0, 0] : f32 from vector<1x1x1xf32>
    %138 = math.log %137 : f32
    %139 = arith.addf %130, %138 : f32
    %cst_62 = arith.constant 0.000000e+00 : f32
    %140 = arith.subf %130, %cst_62 : f32
    %141 = math.exp %140 : f32
    %142 = arith.mulf %137, %141 : f32
    %cst_63 = arith.constant 1.000000e+00 : f32
    %143 = arith.addf %cst_63, %142 : f32
    %144 = math.log %143 : f32
    %cst_64 = arith.constant 0.000000e+00 : f32
    %145 = arith.addf %cst_64, %144 : f32
    %cst_65 = arith.constant 0.000000e+00 : f32
    %146 = arith.subf %cst_65, %130 : f32
    %147 = math.exp %146 : f32
    %148 = arith.addf %147, %137 : f32
    %149 = math.log %148 : f32
    %150 = arith.addf %130, %149 : f32
    %cst_66 = arith.constant 0.000000e+00 : f32
    %151 = arith.cmpf olt, %130, %cst_66 : f32
    %152 = arith.select %151, %145, %150 : f32
    %153 = arith.subf %152, %139 : f32
    %154 = vector.broadcast %153 : f32 to vector<2x64xf32>
    %155 = arith.mulf %154, %104 : vector<2x64xf32>
    %156 = math.tanh %103 : vector<2x64xf32>
    %c0_67 = arith.constant 0 : index
    %c0_68 = arith.constant 0 : index
    %157 = vector.load %arg9[%c0_67, %c0_68] : memref<64x7xf32, #tpu.memory_space<vmem>>, vector<64x7xf32>
    %cst_69 = arith.constant dense<0.000000e+00> : vector<2x7xf32>
    %158 = tpu.matmul %156, %157, %cst_69 {dimension_numbers = #tpu.dot_dimension_numbers<[1], [0], [0], [1], [0, 0, 1, 1], [], []>} : vector<2x64xf32>, vector<64x7xf32>, vector<2x7xf32> -> vector<2x7xf32>
    %c0_70 = arith.constant 0 : index
    %c0_71 = arith.constant 0 : index
    %159 = vector.load %arg10[%c0_70, %c0_71] : memref<1x7xf32, #tpu.memory_space<vmem>>, vector<1x7xf32>
    %160 = vector.broadcast %159 : vector<1x7xf32> to vector<2x7xf32>
    %161 = arith.addf %158, %160 : vector<2x7xf32>
    %162 = vector.shape_cast %161 : vector<2x7xf32> to vector<1x2x7xf32>
    %cst_72 = arith.constant dense<0.000000e+00> : vector<1xf32>
    %163 = vector.multi_reduction <add>, %162, %cst_72 [1, 2] : vector<1x2x7xf32> to vector<1xf32>
    %164 = vector.shape_cast %163 : vector<1xf32> to vector<1x1x1xf32>
    %165 = vector.extract %164[0, 0, 0] : f32 from vector<1x1x1xf32>
    %cst_73 = arith.constant 1.400000e+01 : f32
    %166 = arith.divf %165, %cst_73 : f32
    %167 = vector.broadcast %166 : f32 to vector<2x7xf32>
    %168 = arith.subf %161, %167 : vector<2x7xf32>
    %169 = arith.mulf %168, %168 : vector<2x7xf32>
    %170 = vector.shape_cast %169 : vector<2x7xf32> to vector<1x2x7xf32>
    %cst_74 = arith.constant dense<0.000000e+00> : vector<1xf32>
    %171 = vector.multi_reduction <add>, %170, %cst_74 [1, 2] : vector<1x2x7xf32> to vector<1xf32>
    %172 = vector.shape_cast %171 : vector<1xf32> to vector<1x1x1xf32>
    %173 = vector.extract %172[0, 0, 0] : f32 from vector<1x1x1xf32>
    %cst_75 = arith.constant 0.0769230798 : f32
    %174 = arith.mulf %173, %cst_75 : f32
    %175 = math.sqrt %174 : f32
    %cst_76 = arith.constant 1.000000e+00 : f32
    %176 = arith.divf %cst_76, %174 : f32
    %cst_77 = arith.constant -5.000000e-01 : f32
    %177 = arith.mulf %cst_77, %176 : f32
    %178 = vector.broadcast %177 : f32 to vector<2x7xf32>
    %179 = arith.mulf %178, %169 : vector<2x7xf32>
    %180 = math.log %174 : f32
    %cst_78 = arith.constant -5.000000e-01 : f32
    %181 = arith.mulf %cst_78, %180 : f32
    %cst_79 = arith.constant 0.918938517 : f32
    %182 = arith.subf %181, %cst_79 : f32
    %183 = vector.shape_cast %179 : vector<2x7xf32> to vector<1x2x7xf32>
    %cst_80 = arith.constant dense<0xFF800000> : vector<1xf32>
    %184 = vector.multi_reduction <maximumf>, %183, %cst_80 [1, 2] : vector<1x2x7xf32> to vector<1xf32>
    %185 = vector.shape_cast %184 : vector<1xf32> to vector<1x1x1xf32>
    %186 = vector.extract %185[0, 0, 0] : f32 from vector<1x1x1xf32>
    %187 = arith.addf %186, %182 : f32
    %188 = vector.broadcast %186 : f32 to vector<2x7xf32>
    %189 = arith.subf %179, %188 : vector<2x7xf32>
    %190 = math.exp %189 : vector<2x7xf32>
    %191 = vector.shape_cast %190 : vector<2x7xf32> to vector<1x2x7xf32>
    %cst_81 = arith.constant dense<0.000000e+00> : vector<1xf32>
    %192 = vector.multi_reduction <add>, %191, %cst_81 [1, 2] : vector<1x2x7xf32> to vector<1xf32>
    %193 = vector.shape_cast %192 : vector<1xf32> to vector<1x1x1xf32>
    %194 = vector.extract %193[0, 0, 0] : f32 from vector<1x1x1xf32>
    %195 = math.log %194 : f32
    %196 = arith.addf %187, %195 : f32
    %cst_82 = arith.constant 0.000000e+00 : f32
    %197 = arith.subf %187, %cst_82 : f32
    %198 = math.exp %197 : f32
    %199 = arith.mulf %194, %198 : f32
    %cst_83 = arith.constant 1.000000e+00 : f32
    %200 = arith.addf %cst_83, %199 : f32
    %201 = math.log %200 : f32
    %cst_84 = arith.constant 0.000000e+00 : f32
    %202 = arith.addf %cst_84, %201 : f32
    %cst_85 = arith.constant 0.000000e+00 : f32
    %203 = arith.subf %cst_85, %187 : f32
    %204 = math.exp %203 : f32
    %205 = arith.addf %204, %194 : f32
    %206 = math.log %205 : f32
    %207 = arith.addf %187, %206 : f32
    %cst_86 = arith.constant 0.000000e+00 : f32
    %208 = arith.cmpf olt, %187, %cst_86 : f32
    %209 = arith.select %208, %202, %207 : f32
    %210 = arith.subf %209, %196 : f32
    %211 = vector.broadcast %210 : f32 to vector<2x7xf32>
    %212 = arith.mulf %211, %161 : vector<2x7xf32>
    %213 = arith.cmpf one, %212, %212 : vector<2x7xf32>
    %cst_87 = arith.constant 1.000000e+00 : f32
    %cst_88 = arith.constant 0.000000e+00 : f32
    %214 = vector.broadcast %cst_87 : f32 to vector<2x7xf32>
    %215 = vector.broadcast %cst_88 : f32 to vector<2x7xf32>
    %216 = arith.select %213, %214, %215 : vector<2x7xi1>, vector<2x7xf32>
    %217 = vector.shape_cast %216 : vector<2x7xf32> to vector<1x2x7xf32>
    %cst_89 = arith.constant dense<0.000000e+00> : vector<1xf32>
    %218 = vector.multi_reduction <add>, %217, %cst_89 [1, 2] : vector<1x2x7xf32> to vector<1xf32>
    %219 = vector.shape_cast %218 : vector<1xf32> to vector<1x1x1xf32>
    %220 = vector.extract %219[0, 0, 0] : f32 from vector<1x1x1xf32>
    %cst_90 = arith.constant 0.000000e+00 : f32
    %221 = arith.cmpf ogt, %220, %cst_90 : f32
    %cst_91 = arith.constant 5.000000e-01 : f32
    %222 = vector.broadcast %cst_91 : f32 to vector<2x7xf32>
    %223 = arith.select %221, %222, %212 : vector<2x7xf32>
    %cst_92 = arith.constant dense<0xFF800000> : vector<2xf32>
    %224 = vector.multi_reduction <maximumf>, %223, %cst_92 [1] : vector<2x7xf32> to vector<2xf32>
    %225 = vector.shape_cast %224 : vector<2xf32> to vector<2x1xf32>
    %226 = vector.broadcast %225 : vector<2x1xf32> to vector<2x7xf32>
    %227 = arith.subf %223, %226 : vector<2x7xf32>
    %228 = math.exp %227 : vector<2x7xf32>
    %cst_93 = arith.constant dense<0.000000e+00> : vector<2xf32>
    %229 = vector.multi_reduction <add>, %228, %cst_93 [1] : vector<2x7xf32> to vector<2xf32>
    %230 = vector.shape_cast %229 : vector<2xf32> to vector<2x1xf32>
    %231 = math.log %230 : vector<2x1xf32>
    %232 = vector.broadcast %231 : vector<2x1xf32> to vector<2x7xf32>
    %233 = arith.subf %227, %232 : vector<2x7xf32>
    %234 = math.tanh %155 : vector<2x64xf32>
    %c0_94 = arith.constant 0 : index
    %c0_95 = arith.constant 0 : index
    %235 = vector.load %arg11[%c0_94, %c0_95] : memref<64x1xf32, #tpu.memory_space<vmem>>, vector<64x1xf32>
    %cst_96 = arith.constant dense<0.000000e+00> : vector<2x1xf32>
    %236 = tpu.matmul %234, %235, %cst_96 {dimension_numbers = #tpu.dot_dimension_numbers<[1], [0], [0], [1], [0, 0, 1, 1], [], []>} : vector<2x64xf32>, vector<64x1xf32>, vector<2x1xf32> -> vector<2x1xf32>
    %c0_97 = arith.constant 0 : index
    %c0_98 = arith.constant 0 : index
    %237 = vector.load %arg12[%c0_97, %c0_98] : memref<1x1xf32, #tpu.memory_space<vmem>>, vector<1x1xf32>
    %238 = vector.broadcast %237 : vector<1x1xf32> to vector<2x1xf32>
    %239 = arith.addf %236, %238 : vector<2x1xf32>
    %240 = vector.shape_cast %239 : vector<2x1xf32> to vector<1x2x1xf32>
    %cst_99 = arith.constant dense<0.000000e+00> : vector<1xf32>
    %241 = vector.multi_reduction <add>, %240, %cst_99 [1, 2] : vector<1x2x1xf32> to vector<1xf32>
    %242 = vector.shape_cast %241 : vector<1xf32> to vector<1x1x1xf32>
    %243 = vector.extract %242[0, 0, 0] : f32 from vector<1x1x1xf32>
    %cst_100 = arith.constant 2.000000e+00 : f32
    %244 = arith.divf %243, %cst_100 : f32
    %245 = vector.broadcast %244 : f32 to vector<2x1xf32>
    %246 = arith.subf %239, %245 : vector<2x1xf32>
    %247 = arith.mulf %246, %246 : vector<2x1xf32>
    %248 = vector.shape_cast %247 : vector<2x1xf32> to vector<1x2x1xf32>
    %cst_101 = arith.constant dense<0.000000e+00> : vector<1xf32>
    %249 = vector.multi_reduction <add>, %248, %cst_101 [1, 2] : vector<1x2x1xf32> to vector<1xf32>
    %250 = vector.shape_cast %249 : vector<1xf32> to vector<1x1x1xf32>
    %251 = vector.extract %250[0, 0, 0] : f32 from vector<1x1x1xf32>
    %cst_102 = arith.constant 1.000000e+00 : f32
    %252 = arith.mulf %251, %cst_102 : f32
    %253 = math.sqrt %252 : f32
    %cst_103 = arith.constant 1.000000e+00 : f32
    %254 = arith.divf %cst_103, %252 : f32
    %cst_104 = arith.constant -5.000000e-01 : f32
    %255 = arith.mulf %cst_104, %254 : f32
    %256 = vector.broadcast %255 : f32 to vector<2x1xf32>
    %257 = arith.mulf %256, %247 : vector<2x1xf32>
    %258 = math.log %252 : f32
    %cst_105 = arith.constant -5.000000e-01 : f32
    %259 = arith.mulf %cst_105, %258 : f32
    %cst_106 = arith.constant 0.918938517 : f32
    %260 = arith.subf %259, %cst_106 : f32
    %261 = vector.shape_cast %257 : vector<2x1xf32> to vector<1x2x1xf32>
    %cst_107 = arith.constant dense<0xFF800000> : vector<1xf32>
    %262 = vector.multi_reduction <maximumf>, %261, %cst_107 [1, 2] : vector<1x2x1xf32> to vector<1xf32>
    %263 = vector.shape_cast %262 : vector<1xf32> to vector<1x1x1xf32>
    %264 = vector.extract %263[0, 0, 0] : f32 from vector<1x1x1xf32>
    %265 = arith.addf %264, %260 : f32
    %266 = vector.broadcast %264 : f32 to vector<2x1xf32>
    %267 = arith.subf %257, %266 : vector<2x1xf32>
    %268 = math.exp %267 : vector<2x1xf32>
    %269 = vector.shape_cast %268 : vector<2x1xf32> to vector<1x2x1xf32>
    %cst_108 = arith.constant dense<0.000000e+00> : vector<1xf32>
    %270 = vector.multi_reduction <add>, %269, %cst_108 [1, 2] : vector<1x2x1xf32> to vector<1xf32>
    %271 = vector.shape_cast %270 : vector<1xf32> to vector<1x1x1xf32>
    %272 = vector.extract %271[0, 0, 0] : f32 from vector<1x1x1xf32>
    %273 = math.log %272 : f32
    %274 = arith.addf %265, %273 : f32
    %cst_109 = arith.constant 0.000000e+00 : f32
    %275 = arith.subf %265, %cst_109 : f32
    %276 = math.exp %275 : f32
    %277 = arith.mulf %272, %276 : f32
    %cst_110 = arith.constant 1.000000e+00 : f32
    %278 = arith.addf %cst_110, %277 : f32
    %279 = math.log %278 : f32
    %cst_111 = arith.constant 0.000000e+00 : f32
    %280 = arith.addf %cst_111, %279 : f32
    %cst_112 = arith.constant 0.000000e+00 : f32
    %281 = arith.subf %cst_112, %265 : f32
    %282 = math.exp %281 : f32
    %283 = arith.addf %282, %272 : f32
    %284 = math.log %283 : f32
    %285 = arith.addf %265, %284 : f32
    %cst_113 = arith.constant 0.000000e+00 : f32
    %286 = arith.cmpf olt, %265, %cst_113 : f32
    %287 = arith.select %286, %280, %285 : f32
    %288 = arith.subf %287, %274 : f32
    %289 = vector.broadcast %288 : f32 to vector<2x1xf32>
    %290 = arith.mulf %289, %239 : vector<2x1xf32>
    %cst_114 = arith.constant 0.000000e+00 : f32
    %291 = vector.broadcast %cst_114 : f32 to vector<2x120xf32>
    %292 = tpu.concatenate %233, %290, %291 in 1 : vector<2x7xf32>, vector<2x1xf32>, vector<2x120xf32> -> vector<2x128xf32>
    %c0_115 = arith.constant 0 : index
    %c0_116 = arith.constant 0 : index
    %293 = vector.load %arg13[%c0_115, %c0_116] : memref<2x128xf32, #tpu.memory_space<vmem>>, vector<2x128xf32>
    tpu.vector_store %arg13[%c0_115, %c0_116], %292 {strides = array<i32>} : memref<2x128xf32, #tpu.memory_space<vmem>>, vector<2x128xf32>,
    %c0_117 = arith.constant 0 : index
    %c0_118 = arith.constant 0 : index
    %294 = memref.load %arg14[%c0_117, %c0_118] : memref<4x5xf32, #tpu.memory_space<smem>>
    memref.store %57, %arg14[%c0_117, %c0_118] : memref<4x5xf32, #tpu.memory_space<smem>>
    %c0_119 = arith.constant 0 : index
    %c1_120 = arith.constant 1 : index
    %295 = memref.load %arg14[%c0_119, %c1_120] : memref<4x5xf32, #tpu.memory_space<smem>>
    memref.store %66, %arg14[%c0_119, %c1_120] : memref<4x5xf32, #tpu.memory_space<smem>>
    %cst_121 = arith.constant 1.280000e+02 : f32
    %c0_122 = arith.constant 0 : index
    %c2_123 = arith.constant 2 : index
    %296 = memref.load %arg14[%c0_122, %c2_123] : memref<4x5xf32, #tpu.memory_space<smem>>
    memref.store %cst_121, %arg14[%c0_122, %c2_123] : memref<4x5xf32, #tpu.memory_space<smem>>
    %c0_124 = arith.constant 0 : index
    %c3 = arith.constant 3 : index
    %297 = memref.load %arg14[%c0_124, %c3] : memref<4x5xf32, #tpu.memory_space<smem>>
    memref.store %100, %arg14[%c0_124, %c3] : memref<4x5xf32, #tpu.memory_space<smem>>
    %c0_125 = arith.constant 0 : index
    %c4 = arith.constant 4 : index
    %298 = memref.load %arg14[%c0_125, %c4] : memref<4x5xf32, #tpu.memory_space<smem>>
    memref.store %101, %arg14[%c0_125, %c4] : memref<4x5xf32, #tpu.memory_space<smem>>
    %c1_126 = arith.constant 1 : index
    %c0_127 = arith.constant 0 : index
    %299 = memref.load %arg14[%c1_126, %c0_127] : memref<4x5xf32, #tpu.memory_space<smem>>
    memref.store %166, %arg14[%c1_126, %c0_127] : memref<4x5xf32, #tpu.memory_space<smem>>
    %c1_128 = arith.constant 1 : index
    %c1_129 = arith.constant 1 : index
    %300 = memref.load %arg14[%c1_128, %c1_129] : memref<4x5xf32, #tpu.memory_space<smem>>
    memref.store %175, %arg14[%c1_128, %c1_129] : memref<4x5xf32, #tpu.memory_space<smem>>
    %cst_130 = arith.constant 1.400000e+01 : f32
    %c1_131 = arith.constant 1 : index
    %c2_132 = arith.constant 2 : index
    %301 = memref.load %arg14[%c1_131, %c2_132] : memref<4x5xf32, #tpu.memory_space<smem>>
    memref.store %cst_130, %arg14[%c1_131, %c2_132] : memref<4x5xf32, #tpu.memory_space<smem>>
    %c1_133 = arith.constant 1 : index
    %c3_134 = arith.constant 3 : index
    %302 = memref.load %arg14[%c1_133, %c3_134] : memref<4x5xf32, #tpu.memory_space<smem>>
    memref.store %209, %arg14[%c1_133, %c3_134] : memref<4x5xf32, #tpu.memory_space<smem>>
    %c1_135 = arith.constant 1 : index
    %c4_136 = arith.constant 4 : index
    %303 = memref.load %arg14[%c1_135, %c4_136] : memref<4x5xf32, #tpu.memory_space<smem>>
    memref.store %210, %arg14[%c1_135, %c4_136] : memref<4x5xf32, #tpu.memory_space<smem>>
    %c2_137 = arith.constant 2 : index
    %c0_138 = arith.constant 0 : index
    %304 = memref.load %arg14[%c2_137, %c0_138] : memref<4x5xf32, #tpu.memory_space<smem>>
    memref.store %109, %arg14[%c2_137, %c0_138] : memref<4x5xf32, #tpu.memory_space<smem>>
    %c2_139 = arith.constant 2 : index
    %c1_140 = arith.constant 1 : index
    %305 = memref.load %arg14[%c2_139, %c1_140] : memref<4x5xf32, #tpu.memory_space<smem>>
    memref.store %118, %arg14[%c2_139, %c1_140] : memref<4x5xf32, #tpu.memory_space<smem>>
    %cst_141 = arith.constant 1.280000e+02 : f32
    %c2_142 = arith.constant 2 : index
    %c2_143 = arith.constant 2 : index
    %306 = memref.load %arg14[%c2_142, %c2_143] : memref<4x5xf32, #tpu.memory_space<smem>>
    memref.store %cst_141, %arg14[%c2_142, %c2_143] : memref<4x5xf32, #tpu.memory_space<smem>>
    %c2_144 = arith.constant 2 : index
    %c3_145 = arith.constant 3 : index
    %307 = memref.load %arg14[%c2_144, %c3_145] : memref<4x5xf32, #tpu.memory_space<smem>>
    memref.store %152, %arg14[%c2_144, %c3_145] : memref<4x5xf32, #tpu.memory_space<smem>>
    %c2_146 = arith.constant 2 : index
    %c4_147 = arith.constant 4 : index
    %308 = memref.load %arg14[%c2_146, %c4_147] : memref<4x5xf32, #tpu.memory_space<smem>>
    memref.store %153, %arg14[%c2_146, %c4_147] : memref<4x5xf32, #tpu.memory_space<smem>>
    %c3_148 = arith.constant 3 : index
    %c0_149 = arith.constant 0 : index
    %309 = memref.load %arg14[%c3_148, %c0_149] : memref<4x5xf32, #tpu.memory_space<smem>>
    memref.store %244, %arg14[%c3_148, %c0_149] : memref<4x5xf32, #tpu.memory_space<smem>>
    %c3_150 = arith.constant 3 : index
    %c1_151 = arith.constant 1 : index
    %310 = memref.load %arg14[%c3_150, %c1_151] : memref<4x5xf32, #tpu.memory_space<smem>>
    memref.store %253, %arg14[%c3_150, %c1_151] : memref<4x5xf32, #tpu.memory_space<smem>>
    %cst_152 = arith.constant 2.000000e+00 : f32
    %c3_153 = arith.constant 3 : index
    %c2_154 = arith.constant 2 : index
    %311 = memref.load %arg14[%c3_153, %c2_154] : memref<4x5xf32, #tpu.memory_space<smem>>
    memref.store %cst_152, %arg14[%c3_153, %c2_154] : memref<4x5xf32, #tpu.memory_space<smem>>
    %c3_155 = arith.constant 3 : index
    %c3_156 = arith.constant 3 : index
    %312 = memref.load %arg14[%c3_155, %c3_156] : memref<4x5xf32, #tpu.memory_space<smem>>
    memref.store %287, %arg14[%c3_155, %c3_156] : memref<4x5xf32, #tpu.memory_space<smem>>
    %c3_157 = arith.constant 3 : index
    %c4_158 = arith.constant 4 : index
    %313 = memref.load %arg14[%c3_157, %c4_158] : memref<4x5xf32, #tpu.memory_space<smem>>
    memref.store %288, %arg14[%c3_157, %c4_158] : memref<4x5xf32, #tpu.memory_space<smem>>
    return
  }
}

</mosaic_0001>

<bundles_post_ra>
// kernel: tile.13
= control target key start
LH: loop header
LB: loop body
LE: loop exit
PB: predicated region body
PF: predicated region fallthrough
CT: control target
= control target key end

     0   :  { %s22_s0 = inlined_call_operand.vmem [shape: f32[16], index: 0, kind: input, shape index: {}]   ;;  %s23_s1 = inlined_call_operand.vmem [shape: f32[6,16], index: 1, kind: output, shape index: {}]  }
   0x1   :  { %v4_v0 = vld [vmem:[%s22_s0] ss:$0 sm:$0xff] }
   0x2   :  { %5 = vst [vmem:[%s23_s1] sm:$0xff] %v4_v0 }

// kernel: tile.14
= control target key start
LH: loop header
LB: loop body
LE: loop exit
PB: predicated region body
PF: predicated region fallthrough
CT: control target
= control target key end

     0   :  { %s51_s10 = smov 80   ;;  %s52_s11 = smov 48   ;;  %vm3_vm0 = vcmask 130048   ;;  %vm9_vm1 = vcmask 786048   ;;  %vm15_vm2 = vcmask 654848   ;;  %vm21_vm3 = vcmask 523648   ;;  %s87_s0 = inlined_call_operand.vmem [shape: f32[6,16], index: 0, kind: input, shape index: {}]   ;;  %s88_s1 = inlined_call_operand.vmem [shape: f32[1,96], index: 1, kind: output, shape index: {}]  }
   0x1   :  { %v41_v0 = vld [vmem:[%s87_s0 + $0x5] sm:$0x1]   ;;  %v43_v1 = vld [vmem:[%s87_s0 + $0x3] sm:$0x1]   ;;  %v45_v2 = vld [vmem:[%s87_s0 + $0x1] sm:$0x1]  }
   0x2   :  { %7 = vrot.lane.b32.xlu0 %v41_v0, %s51_s10  ;;  %19 = vrot.lane.b32.xlu1 %v43_v1, %s52_s11  ;;  %s53_s14 = smov 16   ;;  %v42_v3 = vld [vmem:[%s87_s0 + $0x4] sm:$0x1]   ;;  %v44_v4 = vld [vmem:[%s87_s0 + $0x2] sm:$0x1]   ;;  %s54_s19 = smov 64  }
   0x3   :  { %31 = vrot.lane.b32.xlu2 %v45_v2, %s53_s14  ;;  %s55_s20 = smov 32   ;;  %v2_v5 = vld [vmem:[%s87_s0] sm:$0x1]   ;;  %vm27_vm4 = vcmask 392448   ;;  %vm33_vm5 = vcmask 261248  }
   0x4   :  { %4 = vst.msk [vmem:[#allocation0] sm:$0x1] %vm3_vm0, %v2_v5  }
   0xa   :  { %13 = vrot.lane.b32.xlu0 %v42_v3, %s54_s19  ;;  %25 = vrot.lane.b32.xlu1 %v44_v4, %s55_s20 }
  0x5d   :  { %v32_v6 = vpop.permute.xlu2 %31  }
  0x74   :  { %v8_v7 = vpop.permute.xlu0 %7   ;;  %v20_v8 = vpop.permute.xlu1 %19  }
  0x75   :  { %10 = vst.msk [vmem:[#allocation0] sm:$0x1] %vm9_vm1, %v8_v7  }
  0x7c   :  { %v14_v9 = vpop.permute.xlu0 %13   ;;  %v26_v10 = vpop.permute.xlu1 %25  }
  0x7d   :  { %16 = vst.msk [vmem:[#allocation0] sm:$0x1] %vm15_vm2, %v14_v9  }
  0x7e   :  { %22 = vst.msk [vmem:[#allocation0] sm:$0x1] %vm21_vm3, %v20_v8  }
  0x7f   :  { %28 = vst.msk [vmem:[#allocation0] sm:$0x1] %vm27_vm4, %v26_v10  }
  0x80   :  { %34 = vst.msk [vmem:[#allocation0] sm:$0x1] %vm33_vm5, %v32_v6  }
  0x87   :  { %v37_v11 = vld [vmem:[#allocation0] sm:$0x1] }
  0x88   :  { %40 = vst [vmem:[%s88_s1] sm:$0x1] %v37_v11 }

// kernel: tile.18
= control target key start
LH: loop header
LB: loop body
LE: loop exit
PB: predicated region body
PF: predicated region fallthrough
CT: control target
= control target key end

     0   :  { %s22_s0 = inlined_call_operand.vmem [shape: f32[32], index: 0, kind: input, shape index: {}]   ;;  %s23_s1 = inlined_call_operand.vmem [shape: f32[2,32], index: 1, kind: output, shape index: {}]  }
   0x1   :  { %v4_v0 = vld [vmem:[%s22_s0] ss:$0 sm:$0xff] }
   0x2   :  { %5 = vst [vmem:[%s23_s1] sm:$0x3] %v4_v0 }

// kernel: tile.19
= control target key start
LH: loop header
LB: loop body
LE: loop exit
PB: predicated region body
PF: predicated region fallthrough
CT: control target
= control target key end

     0   :  { %vm7_vm0 = vcmask 261120   ;;  %vm13_vm1 = vcmask 523520   ;;  %s39_s0 = inlined_call_operand.vmem [shape: f32[2,32], index: 0, kind: input, shape index: {}]   ;;  %s40_s1 = inlined_call_operand.vmem [shape: f32[1,64], index: 1, kind: output, shape index: {}]  }
   0x1   :  { %v4_v0 = vld [vmem:[%s39_s0] sm:$0x3]  ;;  %s22_s0 = smov 32  }
   0x2   :  { %5 = vst [vmem:[#allocation1] sm:$0x3] %v4_v0 }
   0x9   :  { %v10_v1 = vld [vmem:[#allocation1 + $0x1] sm:$0x1]   ;;  %v6_v2 = vld [vmem:[#allocation1] sm:$0x1]  }
   0xa   :  { %11 = vrot.lane.b32.xlu0 %v10_v1, %s22_s0  ;;  %8 = vst.msk [vmem:[#allocation0] sm:$0x1] %vm7_vm0, %v6_v2  }
  0x7c   :  { %v12_v3 = vpop.permute.xlu0 %11  }
  0x7d   :  { %14 = vst.msk [vmem:[#allocation0] sm:$0x1] %vm13_vm1, %v12_v3  }
  0x84   :  { %v17_v4 = vld [vmem:[#allocation0] sm:$0x1] }
  0x85   :  { %20 = vst [vmem:[%s40_s1] sm:$0x1] %v17_v4 }

// kernel: ac_model_rn_forward.1
= control target key start
LH: loop header
LB: loop body
LE: loop exit
PB: predicated region body
PF: predicated region fallthrough
CT: control target
= control target key end

     0   :  { %s1632_s0 = inlined_call_operand.vmem [shape: f32[12,42], index: 0, kind: input, shape index: {}]   ;;  %s1633_s1 = inlined_call_operand.vmem [shape: f32[42,96], index: 1, kind: input, shape index: {}]   ;;  %s1634_s2 = inlined_call_operand.vmem [shape: f32[1,96], index: 2, kind: input, shape index: {}]   ;;  %s1635_s3 = inlined_call_operand.vmem [shape: f32[96,64], index: 3, kind: input, shape index: {}]   ;;  %s1636_s4 = inlined_call_operand.vmem [shape: f32[1,64], index: 4, kind: input, shape index: {}]   ;;  %s1637_s5 = inlined_call_operand.vmem [shape: f32[128,64], index: 5, kind: input, shape index: {}]   ;;  %s1638_s6 = inlined_call_operand.vmem [shape: f32[1,64], index: 6, kind: input, shape index: {}]   ;;  %s1639_s7 = inlined_call_operand.vmem [shape: f32[64,128], index: 7, kind: input, shape index: {}]   ;;  %s1640_s8 = inlined_call_operand.vmem [shape: f32[1,128], index: 8, kind: input, shape index: {}]   ;;  %s1641_s9 = inlined_call_operand.vmem [shape: f32[64,7], index: 9, kind: input, shape index: {}]   ;;  %s1642_s10 = inlined_call_operand.vmem [shape: f32[1,7], index: 10, kind: input, shape index: {}]   ;;  %s1643_s11 = inlined_call_operand.vmem [shape: f32[64,1], index: 11, kind: input, shape index: {}]   ;;  %s1644_s12 = inlined_call_operand.<no memory space> [shape: f32[1,1], index: 12, kind: input, shape index: {}]   ;;  %s1645_s13 = inlined_call_operand.vmem [shape: f32[2,128], index: 13, kind: output, shape index: {0}]   ;;  %s1646_s14 = inlined_call_operand.vmem [shape: f32[4,5], index: 14, kind: output, shape index: {1}]  }
   0x1   :  { %v20_v0 = vstv %s1644_s12 }
   0x2   :  { %21 = vst [vmem:[#allocation4] sm:$0x1] %v20_v0 }
   0x3   :  { %v56_v1 = vld [vmem:[%s1633_s1 + $0x28] sm:$0x3]  ;;  %vm68_vm0 = vcmask 1041408   ;;  %v55_v2 = vld [vmem:[%s1633_s1 + $0x20] sm:$0xff]  ;;  %v54_v3 = vld [vmem:[%s1633_s1 + $0x18] sm:$0xff] }
   0x4   :  { %967 = vmatpush.msk.msra.mxu0 %vm68_vm0, %v56_v1  ;;  %v53_v4 = vld [vmem:[%s1633_s1 + $0x10] sm:$0xff] }
   0x6   :  { %83 = vmatpush.msra.mxu0 %v55_v2 }
   0x8   :  { %84 = vmatpush.msra.mxu0 %v54_v3 }
   0x9   :  { %22 = vsyncpa [#allocation6], 0  ;;  %v52_v5 = vld [vmem:[%s1633_s1 + $0x8] sm:$0xff]  ;;  %v51_v6 = vld [vmem:[%s1633_s1] sm:$0xff]  ;;  %vm61_vm1 = vcmask 343040   ;;  %vm97_vm2 = vcmask 785408  }
   0xa   :  { %85 = vmatpush.msra.mxu0 %v53_v4  ;;  %v49_v7 = vld [vmem:[%s1632_s0] sm:$0xff]  ;;  %v50_v8 = vld [vmem:[%s1632_s0 + $0x8] sm:$0xf]  ;;  %vm99_vm3 = vcmask 781312   ;;  %s1201_s0 = smov 112   ;;  %s1202_s1 = smov 96  }
   0xb   :  { %v1095_v9 = vld [vmem:[%s1634_s2] ss:$0 sm:$0xff]  ;;  %v153_v21 = vld [vmem:[%s1635_s3 + $0x58] sm:$0xff]  ;;  %v152_v22 = vld [vmem:[%s1635_s3 + $0x50] sm:$0xff]  ;;  %vm117_vm4 = vcmask 130048   ;;  %vm119_vm5 = vcmask 261120  }
   0xc   :  { %86 = vmatpush.msra.mxu0 %v52_v5  ;;  %165 = vmatpush.msra.mxu1 %v153_v21  ;;  %v151_v23 = vld [vmem:[%s1635_s3 + $0x48] sm:$0xff]  ;;  %v150_v24 = vld [vmem:[%s1635_s3 + $0x40] sm:$0xff]  ;;  %v149_v25 = vld [vmem:[%s1635_s3 + $0x38] sm:$0xff]  ;;  %vm121_vm6 = vcmask 390144   ;;  %s1203_s17 = smov 48   ;;  %vm140_vm7 = vcmask 392192  }
   0xd   :  { %v148_v26 = vld [vmem:[%s1635_s3 + $0x30] sm:$0xff]  ;;  %v147_v27 = vld [vmem:[%s1635_s3 + $0x28] sm:$0xff]  ;;  %v146_v28 = vld [vmem:[%s1635_s3 + $0x20] sm:$0xff]  ;;  %vm187_vm8 = vcmask 523264   ;;  %vm265_vm9 = vcmask 517120   ;;  %v1205_v21 = vmov 128.0  }
   0xe   :  { %87 = vmatpush.msra.mxu0 %v51_v6  ;;  %166 = vmatpush.msra.mxu1 %v152_v22  ;;  %v145_v29 = vld [vmem:[%s1635_s3 + $0x18] sm:$0xff]  ;;  %v144_v30 = vld [vmem:[%s1635_s3 + $0x10] sm:$0xff]  ;;  %v143_v33 = vld [vmem:[%s1635_s3 + $0x8] sm:$0xff]  ;;  %1101 = vrcp.f32 %v1205_v21 }
   0xf   :  { %968 = vmatmul.msk.f32.vlgmr.msra.gmra.mxu0 %vm61_vm1, %v49_v7  ;;  %v142_v40 = vld [vmem:[%s1635_s3] sm:$0xff]  ;;  %v204_v46 = vld [vmem:[%s1637_s5 + $0x78] sm:$0xff]  ;;  %v203_v47 = vld [vmem:[%s1637_s5 + $0x70] sm:$0xff] }
  0x10   :  { %167 = vmatpush.msra.mxu1 %v151_v23  ;;  %209 = vmatpush.msra.mxu2 %v204_v46  ;;  %v202_v48 = vld [vmem:[%s1637_s5 + $0x68] sm:$0xff]  ;;  %v201_v49 = vld [vmem:[%s1637_s5 + $0x60] sm:$0xff]  ;;  %v200_v50 = vld [vmem:[%s1637_s5 + $0x58] sm:$0xff] }
  0x11   :  { %v199_v51 = vld [vmem:[%s1637_s5 + $0x50] sm:$0xff]  ;;  %v198_v52 = vld [vmem:[%s1637_s5 + $0x48] sm:$0xff]  ;;  %v197_v53 = vld [vmem:[%s1637_s5 + $0x40] sm:$0xff] }
  0x12   :  { %168 = vmatpush.msra.mxu1 %v150_v24  ;;  %210 = vmatpush.msra.mxu2 %v203_v47  ;;  %v196_v54 = vld [vmem:[%s1637_s5 + $0x38] sm:$0xff]  ;;  %v195_v55 = vld [vmem:[%s1637_s5 + $0x30] sm:$0xff]  ;;  %v194_v56 = vld [vmem:[%s1637_s5 + $0x28] sm:$0xff] }
  0x13   :  { %v193_v57 = vld [vmem:[%s1637_s5 + $0x20] sm:$0xff]  ;;  %v192_v59 = vld [vmem:[%s1637_s5 + $0x18] sm:$0xff]  ;;  %v191_v60 = vld [vmem:[%s1637_s5 + $0x10] sm:$0xff] }
  0x14   :  { %169 = vmatpush.msra.mxu1 %v149_v25  ;;  %211 = vmatpush.msra.mxu2 %v202_v48  ;;  %v1096_v58 = vld [vmem:[%s1636_s4] ss:$0 sm:$0xff]  ;;  %v190_v63 = vld [vmem:[%s1637_s5 + $0x8] sm:$0xff]  ;;  %s1204_s4 = smov 64   ;;  %v237_v3 = vld [vmem:[%s1639_s7 + $0x38] sm:$0xff]  ;;  %v1102_v22 = vpop.eup %1101 }
  0x15   :  { %v189_v2 = vld [vmem:[%s1637_s5] sm:$0xff]  ;;  %v236_v4 = vld [vmem:[%s1639_s7 + $0x30] sm:$0xff]  ;;  %253 = vmatpush.msra.mxu3 %v237_v3  ;;  %v235_v5 = vld [vmem:[%s1639_s7 + $0x28] sm:$0xff]  ;;  %v277_v23 = vmul.f32 128.0, %v1102_v22  ;;  %vm281_vm10 = vweird.f32 %v1102_v22 }
  0x16   :  { %170 = vmatpush.msra.mxu1 %v148_v26  ;;  %212 = vmatpush.msra.mxu2 %v201_v49  ;;  %v234_v6 = vld [vmem:[%s1639_s7 + $0x20] sm:$0xff]  ;;  %v233_v7 = vld [vmem:[%s1639_s7 + $0x18] sm:$0xff] }
  0x17   :  { %969 = vmatmul.msk.f32.gmra.mxu0 %vm61_vm1, %v50_v8  ;;  %254 = vmatpush.msra.mxu3 %v236_v4  ;;  %v278_v24 = vsub.f32 1.0, %v277_v23  ;;  %vm573_vm1 = vcmask 50176  }
  0x18   :  { %171 = vmatpush.msra.mxu1 %v147_v27  ;;  %213 = vmatpush.msra.mxu2 %v200_v50 }
  0x19   :  { %255 = vmatpush.msra.mxu3 %v235_v5 }
  0x1a   :  { %172 = vmatpush.msra.mxu1 %v146_v28  ;;  %214 = vmatpush.msra.mxu2 %v199_v51  ;;  %v279_v28 = vmul.f32 %v1102_v22, %v278_v24 }
  0x1b   :  { %256 = vmatpush.msra.mxu3 %v234_v6 }
  0x1c   :  { %173 = vmatpush.msra.mxu1 %v145_v29  ;;  %215 = vmatpush.msra.mxu2 %v198_v52 }
  0x1d   :  { %257 = vmatpush.msra.mxu3 %v233_v7 }
  0x1e   :  { %174 = vmatpush.msra.mxu1 %v144_v30  ;;  %216 = vmatpush.msra.mxu2 %v197_v53 }
  0x20   :  { %175 = vmatpush.msra.mxu1 %v143_v33  ;;  %217 = vmatpush.msra.mxu2 %v196_v54 }
  0x22   :  { %176 = vmatpush.msra.mxu1 %v142_v40  ;;  %218 = vmatpush.msra.mxu2 %v195_v55 }
  0x24   :  { %219 = vmatpush.msra.mxu2 %v194_v56 }
  0x26   :  { %220 = vmatpush.msra.mxu2 %v193_v57 }
  0x28   :  { %221 = vmatpush.msra.mxu2 %v192_v59 }
  0x2a   :  { %222 = vmatpush.msra.mxu2 %v191_v60 }
  0x2c   :  { %223 = vmatpush.msra.mxu2 %v190_v63 }
  0x2e   :  { %224 = vmatpush.msra.mxu2 %v189_v2 }
  0x8c   :  { %v89_v10 = vpop.f32.mrf.mxu0 }
  0x8d   :  { %v90_v11 = vadd.f32 %v1095_v9, %v89_v10  ;;  %v232_v10 = vld [vmem:[%s1639_s7 + $0x10] sm:$0xff] }
  0x8e   :  { %258 = vmatpush.msra.mxu3 %v232_v10 }
  0x8f   :  { %v95_v12 = vmax.f32 %v90_v11, 0.0  ;;  %v231_v11 = vld [vmem:[%s1639_s7 + $0x8] sm:$0xff] }
  0x90   :  { %259 = vmatpush.msra.mxu3 %v231_v11 }
  0x91   :  { %98 = vst.msk [vmem:[#allocation2] sm:$0xff] %vm97_vm2, %v95_v12  ;;  %v230_v12 = vld [vmem:[%s1639_s7] sm:$0xff] }
  0x92   :  { %260 = vmatpush.msra.mxu3 %v230_v12 }
  0x94   :  { %v92_v13 = vpop.f32.mrf.mxu0 }
  0x95   :  { %v93_v14 = vadd.f32 %v1095_v9, %v92_v13  ;;  %v1097_v13 = vld [vmem:[%s1638_s6] ss:$0 sm:$0xff] }
  0x97   :  { %v96_v15 = vmax.f32 %v93_v14, 0.0 }
  0x99   :  { %100 = vst.msk [vmem:[#allocation2 + $0x8] sm:$0xf] %vm99_vm3, %v96_v15 }
  0xa0   :  { %v101_v16 = vld [vmem:[#allocation2] ss:$2 sm:$0x3f]  ;;  %v103_v17 = vld [vmem:[#allocation2 + $0x1] ss:$2 sm:$0x3f] }
  0xa1   :  { %v104_v18 = vmax.f32 %v101_v16, %v103_v17  ;;  %v1098_v17 = vld [vmem:[%s1640_s8] ss:$0 sm:$0xff] }
  0xa3   :  { %106 = vrot.lane.b32.xlu0 %v104_v18, %s1201_s0 }
 0x115   :  { %v107_v19 = vpop.permute.xlu0 %106 }
 0x116   :  { %v109_v20 = vmax.f32 %v104_v18, %v107_v19 }
 0x118   :  { %114 = vrot.lane.b32.xlu1 %v109_v20, %s1202_s1  ;;  %111 = vrot.lane.b32.xlu0 %v109_v20, %s1201_s0 }
 0x18a   :  { %v115_v31 = vpop.permute.xlu1 %114  ;;  %v112_v32 = vpop.permute.xlu0 %111 }
 0x18b   :  { %v118_v34 = vsel %vm117_vm4, %v109_v20, %v112_v32 }
 0x18c   :  { %v120_v35 = vsel %vm119_vm5, %v118_v34, %v115_v31  ;;  %v280_v31 = vadd.f32 %v1102_v22, %v279_v28 }
 0x18d   :  { %122 = vst.msk [vmem:[#allocation3] sm:$0x3f] %vm121_vm6, %v120_v35 }
 0x18e   :  { %v282_v34 = vsel %vm281_vm10, %v1102_v22, %v280_v31  ;;  %vm475_vm10 = vcmask 1041920  }
 0x194   :  { %v131_v36 = vld [vmem:[#allocation3 + $0x2] ss:$3 sm:$0x3]  ;;  %v125_v38 = vld [vmem:[#allocation3 + $0x1] ss:$3 sm:$0x3] }
 0x195   :  { %v133_v37 = vrot.slane %v131_v36, 6  ;;  %v127_v41 = vrot.slane %v125_v38, 6  ;;  %v123_v42 = vld [vmem:[#allocation3] ss:$3 sm:$0x3] }
 0x197   :  { %v135_v39 = vsel %vm68_vm0, %v125_v38, %v133_v37  ;;  %v129_v44 = vsel %vm68_vm0, %v123_v42, %v127_v41 }
 0x198   :  { %137 = vrot.lane.b32.xlu1 %v135_v39, %s1203_s17 }
 0x20a   :  { %v138_v43 = vpop.permute.xlu1 %137 }
 0x20b   :  { %v141_v45 = vsel %vm140_vm7, %v129_v44, %v138_v43 }
 0x20c   :  { %970 = vmatmul.msk.f32.vlgmr.msra.gmra.mxu1 %vm97_vm2, %v141_v45 }
 0x289   :  { %v178_v61 = vpop.f32.mrf.mxu1 }
 0x28a   :  { %v179_v62 = vadd.f32 %v1096_v58, %v178_v61 }
 0x28c   :  { %v181_v0 = vmax.f32 %v179_v62, 0.0 }
 0x28e   :  { %v183_v1 = vrot.slane %v181_v0, 2 }
 0x290   :  { %184 = vrot.lane.b32.xlu2 %v183_v1, %s1204_s4 }
 0x2ea   :  { %v185_v8 = vpop.permute.xlu2 %184 }
 0x2eb   :  { %v188_v9 = vsel %vm187_vm8, %v181_v0, %v185_v8 }
 0x2ec   :  { %225 = vmatmul.f32.vlgmr.msra.gmra.mxu2 %v188_v9 }
 0x36f   :  { %v226_v14 = vpop.f32.mrf.mxu2 }
 0x370   :  { %v227_v15 = vadd.f32 %v1097_v13, %v226_v14 }
 0x372   :  { %v229_v16 = vmax.f32 %v227_v15, 0.0 }
 0x374   :  { %971 = vmatmul.msk.f32.vlgmr.msra.gmra.mxu3 %vm187_vm8, %v229_v16 }
 0x3f7   :  { %v262_v18 = vpop.f32.mrf.mxu3 }
 0x3f8   :  { %v1444_v19 = vadd.f32 %v1098_v17, %v262_v18 }
 0x3fa   :  { %v266_v20 = vsel %vm265_vm9, %v1444_v19, 0.0 }
 0x3fb   :  { %267 = vadd.xlane.f32.xlu2 %v266_v20 }
 0x46e   :  { %v268_v25 = vpop.xlane.xlu2 %267 }
 0x46f   :  { %v269_v26 = vrot.slane %v268_v25, 4 }
 0x471   :  { %v270_v27 = vadd.f32 %v269_v26, %v268_v25 }
 0x473   :  { %v271_v29 = vrot.slane %v270_v27, 2 }
 0x475   :  { %v272_v30 = vadd.f32 %v271_v29, %v270_v27 }
 0x477   :  { %v273_v32 = vrot.slane %v272_v30, 1 }
 0x479   :  { %v274_v33 = vadd.f32 %v273_v32, %v272_v30 }
 0x47b   :  { %978 = vpush %v274_v33 }
 0x47c   :  { %980 = vpush %v282_v34 }
 0x4ac   :  { %s979_s6 = spop %978 }
 0x4ad   :  { %s1448_s7 = spop %980 }
 0x4ae   :  { %s284_s8 = smul.f32 %s1448_s7, %s979_s6 }
 0x4b0   :  { %v285_v35 = vstv %s284_s8  ;;  %909 = sst [smem:[#allocation5]] %s284_s8 }
 0x4b1   :  { %v286_v36 = vsub.f32 %v1444_v19, %v285_v35 }
 0x4b3   :  { %v287_v37 = vmul.f32 %v286_v36, %v286_v36 }
 0x4b5   :  { %v288_v38 = vsel %vm265_vm9, %v287_v37, 0.0 }
 0x4b6   :  { %289 = vadd.xlane.f32.xlu0 %v288_v38 }
 0x529   :  { %v290_v39 = vpop.xlane.xlu0 %289 }
 0x52a   :  { %v291_v40 = vrot.slane %v290_v39, 4 }
 0x52c   :  { %v292_v41 = vadd.f32 %v291_v40, %v290_v39 }
 0x52e   :  { %v293_v42 = vrot.slane %v292_v41, 2 }
 0x530   :  { %v294_v43 = vadd.f32 %v293_v42, %v292_v41 }
 0x532   :  { %v295_v44 = vrot.slane %v294_v43, 1 }
 0x534   :  { %v296_v45 = vadd.f32 %v295_v44, %v294_v43 }
 0x536   :  { %982 = vpush %v296_v45 }
 0x567   :  { %s983_s29 = spop %982 }
 0x568   :  { %s298_s30 = smul.f32 0.007874016, %s983_s29 }
 0x56a   :  { %v299_v46 = vstv %s298_s30 }
 0x56b   :  { %1103 = vrcp.f32 %v299_v46  ;;  %v310_v58 = vand.u32 2147483648, %v299_v46  ;;  %vm319_vm12 = vweird.f32 %v299_v46  ;;  %v323_v59 = vand.u32 2147483647, %v299_v46 }
 0x56c   :  { %1105 = vrsqrt.f32 %v299_v46  ;;  %vm307_vm14 = vcmp.eq.f32.partialorder %v299_v46, inf  ;;  %vm309_vm15 = vcmp.eq.f32.partialorder %v299_v46, 0.0 }
 0x56d   :  { %1107 = vlog2.f32 %v299_v46  ;;  %v326_v0 = vor.u32 1.1754944e-38, %v310_v58  ;;  %vm324_vm0 = vcmp.eq.f32.partialorder %v323_v59, 8.507059e+37 }
 0x571   :  { %v1104_v47 = vpop.eup %1103 }
 0x572   :  { %v1106_v48 = vpop.eup %1105  ;;  %v315_v49 = vmul.f32 %v1104_v47, %v299_v46  ;;  %vm320_vm11 = vweird.f32 %v1104_v47 }
 0x573   :  { %v301_v50 = vmul.f32 %v1106_v48, %v299_v46  ;;  %vm321_vm13 = vmor %vm319_vm12, %vm320_vm11  ;;  %v1108_v61 = vpop.eup %1107 }
 0x574   :  { %v316_v51 = vsub.f32 1.0, %v315_v49  ;;  %v334_v3 = vmul.f32 0.6931472, %v1108_v61 }
 0x575   :  { %v302_v52 = vmul.f32 %v1106_v48, %v301_v50 }
 0x576   :  { %v317_v53 = vmul.f32 %v1104_v47, %v316_v51  ;;  %v545_v51 = vld [vmem:[%s1641_s9 + $0x38] sm:$0xff] }
 0x577   :  { %v303_v54 = vmul.f32 0.5, %v302_v52  ;;  %561 = vmatpush.msrb.mxu0 %v545_v51  ;;  %v544_v52 = vld [vmem:[%s1641_s9 + $0x30] sm:$0xff] }
 0x578   :  { %v318_v56 = vadd.f32 %v1104_v47, %v317_v53  ;;  %v543_v53 = vld [vmem:[%s1641_s9 + $0x28] sm:$0xff] }
 0x579   :  { %v304_v55 = vsub.f32 1.5, %v303_v54  ;;  %562 = vmatpush.msrb.mxu0 %v544_v52  ;;  %v542_v54 = vld [vmem:[%s1641_s9 + $0x20] sm:$0xff] }
 0x57a   :  { %v322_v62 = vsel %vm321_vm13, %v1104_v47, %v318_v56  ;;  %v540_v56 = vld [vmem:[%s1641_s9 + $0x10] sm:$0xff] }
 0x57b   :  { %v305_v57 = vmul.f32 %v1106_v48, %v304_v55  ;;  %v327_v2 = vsel %vm324_vm0, %v326_v0, %v322_v62  ;;  %563 = vmatpush.msrb.mxu0 %v543_v53  ;;  %v541_v55 = vld [vmem:[%s1641_s9 + $0x18] sm:$0xff] }
 0x57d   :  { %v306_v60 = vmul.f32 %v305_v57, %v299_v46  ;;  %564 = vmatpush.msrb.mxu0 %v542_v54  ;;  %v539_v57 = vld [vmem:[%s1641_s9 + $0x8] sm:$0xff] }
 0x57f   :  { %v308_v63 = vsel %vm307_vm14, %v299_v46, %v306_v60  ;;  %565 = vmatpush.msrb.mxu0 %v541_v55 }
 0x580   :  { %v311_v1 = vsel %vm309_vm15, %v310_v58, %v308_v63  ;;  %v538_v58 = vld [vmem:[%s1641_s9] sm:$0xff] }
 0x581   :  { %984 = vpush %v311_v1  ;;  %566 = vmatpush.msrb.mxu0 %v540_v56 }
 0x582   :  { %986 = vpush %v327_v2 }
 0x583   :  { %988 = vpush %v334_v3  ;;  %567 = vmatpush.msrb.mxu0 %v539_v57  ;;  %v1099_v3 = vld [vmem:[%s1642_s10] ss:$0 sm:$0xff] }
 0x585   :  { %568 = vmatpush.msrb.mxu0 %v538_v58 }
 0x5b2   :  { %s985_s15 = spop %984 }
 0x5b3   :  { %911 = sst [smem:[#allocation5 + $0x1]] %s985_s15  ;;  %s987_s0 = spop %986 }
 0x5b4   :  { %s329_s1 = smul.f32 -0.5, %s987_s0  ;;  %s989_s2 = spop %988 }
 0x5b5   :  { %s336_s17 = smul.f32 -0.5, %s989_s2 }
 0x5b6   :  { %v330_v4 = vstv %s329_s1 }
 0x5b7   :  { %v331_v5 = vmul.f32 %v330_v4, %v287_v37  ;;  %s972_s18 = sadd.f32 -0.9189385, %s336_s17 }
 0x5b9   :  { %v338_v6 = vsel %vm265_vm9, %v331_v5, -inf }
 0x5ba   :  { %339 = vmax.xlane.f32.xlu1 %v338_v6 }
 0x62d   :  { %v340_v7 = vpop.xlane.xlu1 %339 }
 0x62e   :  { %v341_v8 = vrot.slane %v340_v7, 4 }
 0x630   :  { %v342_v9 = vmax.f32 %v340_v7, %v341_v8 }
 0x632   :  { %v343_v10 = vrot.slane %v342_v9, 2 }
 0x634   :  { %v344_v11 = vmax.f32 %v342_v9, %v343_v10 }
 0x636   :  { %v345_v12 = vrot.slane %v344_v11, 1 }
 0x638   :  { %v346_v13 = vmax.f32 %v344_v11, %v345_v12 }
 0x63a   :  { %990 = vpush %v346_v13 }
 0x66b   :  { %s991_s16 = spop %990 }
 0x66c   :  { %v349_v14 = vstv %s991_s16  ;;  %s1458_s19 = sadd.f32 %s991_s16, %s972_s18 }
 0x66d   :  { %v350_v15 = vsub.f32 %v331_v5, %v349_v14 }
 0x66e   :  { %v368_v29 = vstv %s1458_s19  ;;  %s379_s20 = ssub.f32 0.0, %s1458_s19  ;;  %p390_p0 = scmp.lt.f32.partialorder %s1458_s19, 0.0 }
 0x66f   :  { %v351_v16 = vmul.f32 1.442695, %v350_v15  ;;  %v369_v31 = vmul.f32 1.442695, %v368_v29 }
 0x670   :  { %v380_v35 = vstv %s379_s20 }
 0x671   :  { %1109 = vpow2.f32 %v351_v16  ;;  %v381_v37 = vmul.f32 1.442695, %v380_v35 }
 0x677   :  { %v1110_v17 = vpop.eup %1109 }
 0x678   :  { %v353_v18 = vsel %vm265_vm9, %v1110_v17, 0.0 }
 0x679   :  { %354 = vadd.xlane.f32.xlu2 %v353_v18 }
 0x691   :  { %396 = vrot.lane.b32.xlu2 %v1444_v19, %s1204_s4 }
 0x6ec   :  { %v355_v20 = vpop.xlane.xlu2 %354 }
 0x6ed   :  { %v356_v21 = vrot.slane %v355_v20, 4 }
 0x6ef   :  { %v357_v22 = vadd.f32 %v356_v21, %v355_v20 }
 0x6f1   :  { %v358_v23 = vrot.slane %v357_v22, 2 }
 0x6f3   :  { %v359_v24 = vadd.f32 %v358_v23, %v357_v22 }
 0x6f4   :  { %v397_v25 = vpop.permute.xlu2 %396 }
 0x6f5   :  { %v399_v26 = vsel %vm265_vm9, %v397_v25, 0.0  ;;  %v360_v27 = vrot.slane %v359_v24, 1 }
 0x6f6   :  { %400 = vadd.xlane.f32.xlu0 %v399_v26 }
 0x6f7   :  { %v361_v28 = vadd.f32 %v360_v27, %v359_v24 }
 0x6f9   :  { %992 = vpush %v361_v28 }
 0x72a   :  { %s1461_s5 = spop %992 }
 0x72b   :  { %v363_v30 = vstv %s1461_s5 }
 0x72c   :  { %1111 = vlog2.f32 %v363_v30 }
 0x72d   :  { %1113 = vpow2.f32 %v369_v31 }
 0x732   :  { %v1112_v32 = vpop.eup %1111 }
 0x733   :  { %v365_v33 = vmul.f32 0.6931472, %v1112_v32  ;;  %v1114_v34 = vpop.eup %1113 }
 0x735   :  { %994 = vpush %v365_v33 }
 0x736   :  { %996 = vpush %v1114_v34 }
 0x766   :  { %s1465_s21 = spop %994 }
 0x767   :  { %s997_s22 = spop %996 }
 0x768   :  { %s372_s12 = smul.f32 %s997_s22, %s1461_s5 }
 0x769   :  { %v401_v41 = vpop.xlane.xlu0 %400 }
 0x76a   :  { %s373_s3 = sadd.f32 1.0, %s372_s12  ;;  %v402_v42 = vrot.slane %v401_v41, 4 }
 0x76c   :  { %v374_v36 = vstv %s373_s3  ;;  %v403_v43 = vadd.f32 %v402_v42, %v401_v41 }
 0x76d   :  { %1115 = vlog2.f32 %v374_v36 }
 0x76e   :  { %1117 = vpow2.f32 %v381_v37  ;;  %v404_v44 = vrot.slane %v403_v43, 2 }
 0x770   :  { %v405_v46 = vadd.f32 %v404_v44, %v403_v43 }
 0x772   :  { %v406_v47 = vrot.slane %v405_v46, 1 }
 0x773   :  { %v1116_v38 = vpop.eup %1115 }
 0x774   :  { %v376_v39 = vmul.f32 0.6931472, %v1116_v38  ;;  %v1118_v40 = vpop.eup %1117  ;;  %v407_v50 = vadd.f32 %v406_v47, %v405_v46 }
 0x776   :  { %998 = vpush %v376_v39 }
 0x777   :  { %1000 = vpush %v1118_v40 }
 0x7a7   :  { %s1468_s23 = spop %998 }
 0x7a8   :  { %s1001_s24 = spop %1000 }
 0x7a9   :  { %s384_s25 = sadd.f32 %s1001_s24, %s1461_s5 }
 0x7aa   :  { %s367_s24 = sadd.f32 %s1465_s21, %s1458_s19 }
 0x7ab   :  { %v385_v45 = vstv %s384_s25 }
 0x7ac   :  { %1119 = vlog2.f32 %v385_v45 }
 0x7b2   :  { %v1120_v48 = vpop.eup %1119 }
 0x7b3   :  { %v387_v49 = vmul.f32 0.6931472, %v1120_v48 }
 0x7b5   :  { %1002 = vpush %v387_v49 }
 0x7b6   :  { %1004 = vpush %v407_v50 }
 0x7e6   :  { %s1003_s22 = spop %1002 }
 0x7e7   :  { %s389_s12 = sadd.f32 %s1003_s22, %s1458_s19  ;;  %s1005_s3 = spop %1004 }
 0x7e8   :  { %s417_s25 = smul.f32 %s1005_s3, %s1448_s7 }
 0x7e9   :  { %s1648_s23 = smov (!%p390_p0, %s1468_s23), %s389_s12 }
 0x7ea   :  { %v418_v59 = vstv %s417_s25  ;;  %929 = sst [smem:[#allocation5 + $0x100]] %s417_s25 }
 0x7eb   :  { %s392_s26 = ssub.f32 %s1648_s23, %s367_s24  ;;  %v419_v60 = vsub.f32 %v1444_v19, %v418_v59 }
 0x7ec   :  { %915 = sst [smem:[#allocation5 + $0x3]] %s1648_s23 }
 0x7ed   :  { %v393_v61 = vstv %s392_s26  ;;  %917 = sst [smem:[#allocation5 + $0x4]] %s392_s26  ;;  %v1502_v62 = vmul.f32 %v419_v60, %v419_v60 }
 0x7ee   :  { %v394_v63 = vmul.f32 %v393_v61, %v1444_v19 }
 0x7ef   :  { %422 = vrot.lane.b32.xlu1 %v1502_v62, %s1204_s4 }
 0x7f0   :  { %1121 = vtanh.f32 %v394_v63 }
 0x7f6   :  { %v1122_v0 = vpop.eup %1121 }
 0x7f7   :  { %974 = vmatmul.msk.f32.vlgmr.msrb.gmra.mxu0 %vm187_vm8, %v1122_v0 }
 0x861   :  { %v423_v1 = vpop.permute.xlu1 %422 }
 0x862   :  { %v425_v2 = vsel %vm265_vm9, %v423_v1, 0.0 }
 0x863   :  { %426 = vadd.xlane.f32.xlu0 %v425_v2 }
 0x874   :  { %v570_v4 = vpop.f32.mrf.mxu0 }
 0x875   :  { %v1512_v5 = vadd.f32 %v1099_v3, %v570_v4 }
 0x877   :  { %v574_v6 = vsel %vm573_vm1, %v1512_v5, 0.0 }
 0x878   :  { %575 = vadd.xlane.f32.xlu1 %v574_v6 }
 0x8d6   :  { %v427_v7 = vpop.xlane.xlu0 %426 }
 0x8d7   :  { %v428_v8 = vrot.slane %v427_v7, 4 }
 0x8d9   :  { %v429_v9 = vadd.f32 %v428_v8, %v427_v7 }
 0x8db   :  { %v430_v10 = vrot.slane %v429_v9, 2 }
 0x8dd   :  { %v431_v11 = vadd.f32 %v430_v10, %v429_v9  ;;  %v1206_v9 = vmov 14.0  }
 0x8df   :  { %v432_v12 = vrot.slane %v431_v11, 1 }
 0x8e1   :  { %v433_v13 = vadd.f32 %v432_v12, %v431_v11 }
 0x8e3   :  { %1006 = vpush %v433_v13 }
 0x8eb   :  { %v576_v10 = vpop.xlane.xlu1 %575 }
 0x8ec   :  { %v577_v11 = vrot.slane %v576_v10, 4 }
 0x8ee   :  { %v578_v13 = vadd.f32 %v577_v11, %v576_v10 }
 0x914   :  { %s1007_s19 = spop %1006 }
 0x915   :  { %s435_s21 = smul.f32 0.007874016, %s1007_s19 }
 0x917   :  { %v436_v14 = vstv %s435_s21 }
 0x918   :  { %1123 = vrcp.f32 %v436_v14  ;;  %v447_v27 = vand.u32 2147483648, %v436_v14  ;;  %vm456_vm3 = vweird.f32 %v436_v14  ;;  %v460_v28 = vand.u32 2147483647, %v436_v14 }
 0x919   :  { %1125 = vrsqrt.f32 %v436_v14  ;;  %vm444_vm5 = vcmp.eq.f32.partialorder %v436_v14, inf  ;;  %vm446_vm6 = vcmp.eq.f32.partialorder %v436_v14, 0.0 }
 0x91a   :  { %1127 = vlog2.f32 %v436_v14  ;;  %v463_v33 = vor.u32 1.1754944e-38, %v447_v27  ;;  %vm461_vm7 = vcmp.eq.f32.partialorder %v460_v28, 8.507059e+37 }
 0x91e   :  { %v1124_v15 = vpop.eup %1123 }
 0x91f   :  { %v1126_v16 = vpop.eup %1125  ;;  %v452_v17 = vmul.f32 %v1124_v15, %v436_v14  ;;  %vm457_vm2 = vweird.f32 %v1124_v15 }
 0x920   :  { %v438_v18 = vmul.f32 %v1126_v16, %v436_v14  ;;  %vm458_vm4 = vmor %vm456_vm3, %vm457_vm2  ;;  %v1128_v30 = vpop.eup %1127 }
 0x921   :  { %v453_v20 = vsub.f32 1.0, %v452_v17  ;;  %v471_v36 = vmul.f32 0.6931472, %v1128_v30 }
 0x922   :  { %v439_v21 = vmul.f32 %v1126_v16, %v438_v18 }
 0x923   :  { %v454_v22 = vmul.f32 %v1124_v15, %v453_v20 }
 0x924   :  { %v440_v23 = vmul.f32 0.5, %v439_v21 }
 0x925   :  { %v455_v25 = vadd.f32 %v1124_v15, %v454_v22 }
 0x926   :  { %v441_v24 = vsub.f32 1.5, %v440_v23 }
 0x927   :  { %v459_v31 = vsel %vm458_vm4, %v1124_v15, %v455_v25  ;;  %v579_v15 = vrot.slane %v578_v13, 2 }
 0x928   :  { %v442_v26 = vmul.f32 %v1126_v16, %v441_v24  ;;  %v464_v35 = vsel %vm461_vm7, %v463_v33, %v459_v31 }
 0x929   :  { %v580_v18 = vadd.f32 %v579_v15, %v578_v13  ;;  %v740_v15 = vld [vmem:[%s1643_s11 + $0x38] sm:$0xff] }
 0x92a   :  { %v443_v29 = vmul.f32 %v442_v26, %v436_v14  ;;  %758 = vmatpush.msrb.mxu3 %v740_v15 }
 0x92b   :  { %v581_v21 = vrot.slane %v580_v18, 1 }
 0x92c   :  { %v445_v32 = vsel %vm444_vm5, %v436_v14, %v443_v29 }
 0x92d   :  { %v448_v34 = vsel %vm446_vm6, %v447_v27, %v445_v32  ;;  %v582_v25 = vadd.f32 %v581_v21, %v580_v18  ;;  %v736_v18 = vld [vmem:[%s1643_s11 + $0x18] sm:$0xff]  ;;  %v734_v21 = vld [vmem:[%s1643_s11 + $0x8] sm:$0xff] }
 0x92e   :  { %1008 = vpush %v448_v34 }
 0x92f   :  { %1010 = vpush %v464_v35 }
 0x930   :  { %1012 = vpush %v471_v36 }
 0x95f   :  { %s1009_s10 = spop %1008 }
 0x960   :  { %931 = sst [smem:[#allocation5 + $0x101]] %s1009_s10  ;;  %s1011_s23 = spop %1010 }
 0x961   :  { %s466_s27 = smul.f32 -0.5, %s1011_s23  ;;  %s1013_s28 = spop %1012 }
 0x962   :  { %s473_s8 = smul.f32 -0.5, %s1013_s28 }
 0x963   :  { %v467_v37 = vstv %s466_s27 }
 0x964   :  { %v468_v38 = vmul.f32 %v467_v37, %v1502_v62  ;;  %s973_s29 = sadd.f32 -0.9189385, %s473_s8 }
 0x966   :  { %v476_v39 = vsel %vm475_vm10, %v468_v38, -inf }
 0x967   :  { %477 = vmax.xlane.f32.xlu0 %v476_v39 }
 0x9da   :  { %v478_v40 = vpop.xlane.xlu0 %477 }
 0x9db   :  { %v479_v41 = vrot.slane %v478_v40, 4 }
 0x9dd   :  { %v480_v42 = vmax.f32 %v478_v40, %v479_v41 }
 0x9df   :  { %v481_v43 = vrot.slane %v480_v42, 2 }
 0x9e1   :  { %v482_v44 = vmax.f32 %v480_v42, %v481_v43 }
 0x9e3   :  { %v483_v45 = vrot.slane %v482_v44, 1 }
 0x9e5   :  { %v484_v46 = vmax.f32 %v482_v44, %v483_v45 }
 0x9e7   :  { %1014 = vpush %v484_v46 }
 0xa18   :  { %s1015_s6 = spop %1014 }
 0xa19   :  { %v487_v47 = vstv %s1015_s6  ;;  %s1519_s30 = sadd.f32 %s1015_s6, %s973_s29 }
 0xa1a   :  { %v488_v48 = vsub.f32 %v468_v38, %v487_v47 }
 0xa1b   :  { %v510_v60 = vstv %s1519_s30  ;;  %s521_s0 = ssub.f32 0.0, %s1519_s30  ;;  %p532_p1 = scmp.lt.f32.partialorder %s1519_s30, 0.0 }
 0xa1c   :  { %v489_v49 = vmul.f32 1.442695, %v488_v48  ;;  %v511_v62 = vmul.f32 1.442695, %v510_v60 }
 0xa1d   :  { %v522_v2 = vstv %s521_s0 }
 0xa1e   :  { %1129 = vpow2.f32 %v489_v49  ;;  %v523_v4 = vmul.f32 1.442695, %v522_v2 }
 0xa24   :  { %v1130_v50 = vpop.eup %1129 }
 0xa25   :  { %492 = vrot.lane.b32.xlu2 %v1130_v50, %s1204_s4 }
 0xa7f   :  { %v493_v51 = vpop.permute.xlu2 %492 }
 0xa80   :  { %v495_v52 = vsel %vm265_vm9, %v493_v51, 0.0 }
 0xa81   :  { %496 = vadd.xlane.f32.xlu0 %v495_v52 }
 0xaf4   :  { %v497_v53 = vpop.xlane.xlu0 %496 }
 0xaf5   :  { %v498_v54 = vrot.slane %v497_v53, 4 }
 0xaf7   :  { %v499_v55 = vadd.f32 %v498_v54, %v497_v53 }
 0xaf9   :  { %v500_v56 = vrot.slane %v499_v55, 2 }
 0xafb   :  { %v501_v57 = vadd.f32 %v500_v56, %v499_v55 }
 0xafd   :  { %v502_v58 = vrot.slane %v501_v57, 1 }
 0xaff   :  { %v503_v59 = vadd.f32 %v502_v58, %v501_v57 }
 0xb01   :  { %1016 = vpush %v503_v59 }
 0xb32   :  { %s1522_s15 = spop %1016 }
 0xb33   :  { %v505_v61 = vstv %s1522_s15 }
 0xb34   :  { %1131 = vlog2.f32 %v505_v61 }
 0xb35   :  { %1133 = vpow2.f32 %v511_v62 }
 0xb3a   :  { %v1132_v63 = vpop.eup %1131 }
 0xb3b   :  { %v507_v0 = vmul.f32 0.6931472, %v1132_v63  ;;  %v1134_v1 = vpop.eup %1133 }
 0xb3d   :  { %1018 = vpush %v507_v0 }
 0xb3e   :  { %1020 = vpush %v1134_v1 }
 0xb6e   :  { %s1526_s1 = spop %1018 }
 0xb6f   :  { %s1021_s2 = spop %1020  ;;  %s509_s24 = sadd.f32 %s1526_s1, %s1519_s30 }
 0xb70   :  { %s514_s16 = smul.f32 %s1021_s2, %s1522_s15 }
 0xb72   :  { %s515_s17 = sadd.f32 1.0, %s514_s16 }
 0xb74   :  { %v516_v3 = vstv %s515_s17 }
 0xb75   :  { %1135 = vlog2.f32 %v516_v3 }
 0xb76   :  { %1137 = vpow2.f32 %v523_v4 }
 0xb77   :  { %1139 = vrcp.f32 %v1206_v9 }
 0xb7b   :  { %v1136_v6 = vpop.eup %1135 }
 0xb7c   :  { %v518_v7 = vmul.f32 0.6931472, %v1136_v6  ;;  %v1138_v8 = vpop.eup %1137 }
 0xb7d   :  { %v1140_v12 = vpop.eup %1139 }
 0xb7e   :  { %1022 = vpush %v518_v7  ;;  %v585_v14 = vmul.f32 14.0, %v1140_v12  ;;  %vm589_vm9 = vweird.f32 %v1140_v12 }
 0xb7f   :  { %1024 = vpush %v1138_v8 }
 0xb80   :  { %v586_v16 = vsub.f32 1.0, %v585_v14 }
 0xb82   :  { %v587_v20 = vmul.f32 %v1140_v12, %v586_v16  ;;  %v739_v16 = vld [vmem:[%s1643_s11 + $0x30] sm:$0xff] }
 0xb83   :  { %759 = vmatpush.msrb.mxu3 %v739_v16 }
 0xb84   :  { %v588_v22 = vadd.f32 %v1140_v12, %v587_v20  ;;  %v735_v20 = vld [vmem:[%s1643_s11 + $0x10] sm:$0xff] }
 0xb86   :  { %v590_v26 = vsel %vm589_vm9, %v1140_v12, %v588_v22  ;;  %v733_v22 = vld [vmem:[%s1643_s11] sm:$0xff] }
 0xbaf   :  { %s1023_s18 = spop %1022 }
 0xbb0   :  { %s1025_s5 = spop %1024 }
 0xbb1   :  { %s526_s20 = sadd.f32 %s1025_s5, %s1522_s15 }
 0xbb3   :  { %v527_v17 = vstv %s526_s20 }
 0xbb4   :  { %1141 = vlog2.f32 %v527_v17  ;;  %v738_v17 = vld [vmem:[%s1643_s11 + $0x28] sm:$0xff] }
 0xbb5   :  { %760 = vmatpush.msrb.mxu3 %v738_v17 }
 0xbba   :  { %v1142_v23 = vpop.eup %1141 }
 0xbbb   :  { %v529_v24 = vmul.f32 0.6931472, %v1142_v23 }
 0xbbd   :  { %1026 = vpush %v529_v24 }
 0xbbe   :  { %1028 = vpush %v582_v25 }
 0xbbf   :  { %1030 = vpush %v590_v26 }
 0xbee   :  { %s1027_s22 = spop %1026 }
 0xbef   :  { %s531_s12 = sadd.f32 %s1027_s22, %s1519_s30  ;;  %s1029_s3 = spop %1028 }
 0xbf0   :  { %s1031_s25 = spop %1030 }
 0xbf1   :  { %s1650_s18 = smov (!%p532_p1, %s1023_s18), %s531_s12  ;;  %s592_s26 = smul.f32 %s1031_s25, %s1029_s3 }
 0xbf2   :  { %s1534_s9 = ssub.f32 %s1650_s18, %s509_s24 }
 0xbf3   :  { %935 = sst [smem:[#allocation5 + $0x103]] %s1650_s18  ;;  %v593_v27 = vstv %s592_s26 }
 0xbf4   :  { %937 = sst [smem:[#allocation5 + $0x104]] %s1534_s9  ;;  %v594_v28 = vsub.f32 %v1512_v5, %v593_v27  ;;  %v535_v12 = vstv %s1534_s9 }
 0xbf5   :  { %919 = sst [smem:[#allocation5 + $0x80]] %s592_s26  ;;  %v536_v13 = vmul.f32 %v535_v12, %v1444_v19  ;;  %v737_v19 = vld [vmem:[%s1643_s11 + $0x20] sm:$0xff] }
 0xbf6   :  { %v595_v29 = vmul.f32 %v594_v28, %v594_v28  ;;  %761 = vmatpush.msrb.mxu3 %v737_v19 }
 0xbf8   :  { %v596_v30 = vsel %vm573_vm1, %v595_v29, 0.0  ;;  %762 = vmatpush.msrb.mxu3 %v736_v18 }
 0xbf9   :  { %597 = vadd.xlane.f32.xlu2 %v596_v30 }
 0xbfa   :  { %763 = vmatpush.msrb.mxu3 %v735_v20 }
 0xbfc   :  { %764 = vmatpush.msrb.mxu3 %v734_v21 }
 0xbfe   :  { %765 = vmatpush.msrb.mxu3 %v733_v22 }
 0xc6c   :  { %v598_v31 = vpop.xlane.xlu2 %597 }
 0xc6d   :  { %v599_v32 = vrot.slane %v598_v31, 4 }
 0xc6f   :  { %v600_v33 = vadd.f32 %v599_v32, %v598_v31 }
 0xc71   :  { %v601_v34 = vrot.slane %v600_v33, 2 }
 0xc73   :  { %v602_v35 = vadd.f32 %v601_v34, %v600_v33 }
 0xc75   :  { %v603_v36 = vrot.slane %v602_v35, 1 }
 0xc77   :  { %v604_v37 = vadd.f32 %v603_v36, %v602_v35 }
 0xc79   :  { %1032 = vpush %v604_v37 }
 0xcaa   :  { %s1033_s7 = spop %1032 }
 0xcab   :  { %s606_s19 = smul.f32 0.07692308, %s1033_s7 }
 0xcad   :  { %v607_v38 = vstv %s606_s19 }
 0xcae   :  { %1143 = vrcp.f32 %v607_v38  ;;  %v618_v50 = vand.u32 2147483648, %v607_v38  ;;  %vm627_vm12 = vweird.f32 %v607_v38  ;;  %v631_v51 = vand.u32 2147483647, %v607_v38 }
 0xcaf   :  { %1145 = vrsqrt.f32 %v607_v38  ;;  %vm615_vm14 = vcmp.eq.f32.partialorder %v607_v38, inf  ;;  %vm617_vm15 = vcmp.eq.f32.partialorder %v607_v38, 0.0 }
 0xcb0   :  { %1147 = vlog2.f32 %v607_v38  ;;  %v634_v56 = vor.u32 1.1754944e-38, %v618_v50  ;;  %vm632_vm0 = vcmp.eq.f32.partialorder %v631_v51, 8.507059e+37 }
 0xcb4   :  { %v1144_v39 = vpop.eup %1143 }
 0xcb5   :  { %v1146_v40 = vpop.eup %1145  ;;  %v623_v41 = vmul.f32 %v1144_v39, %v607_v38  ;;  %vm628_vm11 = vweird.f32 %v1144_v39 }
 0xcb6   :  { %v609_v42 = vmul.f32 %v1146_v40, %v607_v38  ;;  %vm629_vm13 = vmor %vm627_vm12, %vm628_vm11  ;;  %v1148_v53 = vpop.eup %1147  ;;  %vm905_vm12 = vcmask 64512  }
 0xcb7   :  { %v624_v43 = vsub.f32 1.0, %v623_v41  ;;  %v642_v59 = vmul.f32 0.6931472, %v1148_v53 }
 0xcb8   :  { %v610_v44 = vmul.f32 %v1146_v40, %v609_v42 }
 0xcb9   :  { %v625_v45 = vmul.f32 %v1144_v39, %v624_v43  ;;  %v1100_v43 = vld [vmem:[#allocation4] ss:$0 sm:$0xff] }
 0xcba   :  { %v611_v46 = vmul.f32 0.5, %v610_v44 }
 0xcbb   :  { %v626_v48 = vadd.f32 %v1144_v39, %v625_v45 }
 0xcbc   :  { %v612_v47 = vsub.f32 1.5, %v611_v46 }
 0xcbd   :  { %v630_v54 = vsel %vm629_vm13, %v1144_v39, %v626_v48 }
 0xcbe   :  { %v613_v49 = vmul.f32 %v1146_v40, %v612_v47  ;;  %v635_v58 = vsel %vm632_vm0, %v634_v56, %v630_v54 }
 0xcc0   :  { %v614_v52 = vmul.f32 %v613_v49, %v607_v38 }
 0xcc2   :  { %v616_v55 = vsel %vm615_vm14, %v607_v38, %v614_v52  ;;  %v1207_v52 = vmov 0.0  }
 0xcc3   :  { %v619_v57 = vsel %vm617_vm15, %v618_v50, %v616_v55  ;;  %v1208_v55 = vmov 2.0  }
 0xcc4   :  { %1034 = vpush %v619_v57 }
 0xcc5   :  { %1036 = vpush %v635_v58 }
 0xcc6   :  { %1038 = vpush %v642_v59 }
 0xcf5   :  { %s1035_s21 = spop %1034 }
 0xcf6   :  { %921 = sst [smem:[#allocation5 + $0x81]] %s1035_s21  ;;  %s1037_s10 = spop %1036 }
 0xcf7   :  { %s637_s23 = smul.f32 -0.5, %s1037_s10  ;;  %s1540_s27 = spop %1038 }
 0xcf8   :  { %s644_s3 = smul.f32 -0.5, %s1540_s27 }
 0xcf9   :  { %v638_v60 = vstv %s637_s23 }
 0xcfa   :  { %v639_v61 = vmul.f32 %v638_v60, %v595_v29  ;;  %s975_s24 = sadd.f32 -0.9189385, %s644_s3 }
 0xcfc   :  { %v646_v62 = vsel %vm573_vm1, %v639_v61, -inf }
 0xcfd   :  { %647 = vmax.xlane.f32.xlu0 %v646_v62 }
 0xd70   :  { %v648_v63 = vpop.xlane.xlu0 %647 }
 0xd71   :  { %v649_v0 = vrot.slane %v648_v63, 4 }
 0xd73   :  { %v650_v1 = vmax.f32 %v648_v63, %v649_v0 }
 0xd75   :  { %v651_v2 = vrot.slane %v650_v1, 2 }
 0xd77   :  { %v652_v3 = vmax.f32 %v650_v1, %v651_v2 }
 0xd79   :  { %v653_v4 = vrot.slane %v652_v3, 1 }
 0xd7b   :  { %v654_v6 = vmax.f32 %v652_v3, %v653_v4 }
 0xd7d   :  { %1040 = vpush %v654_v6 }
 0xdae   :  { %s1542_s28 = spop %1040 }
 0xdaf   :  { %v657_v7 = vstv %s1542_s28  ;;  %s1576_s25 = sadd.f32 %s1542_s28, %s975_s24 }
 0xdb0   :  { %v658_v8 = vsub.f32 %v639_v61, %v657_v7 }
 0xdb1   :  { %v676_v31 = vstv %s1576_s25  ;;  %s687_s26 = ssub.f32 0.0, %s1576_s25  ;;  %p698_p2 = scmp.lt.f32.partialorder %s1576_s25, 0.0 }
 0xdb2   :  { %v659_v9 = vmul.f32 1.442695, %v658_v8  ;;  %v677_v33 = vmul.f32 1.442695, %v676_v31 }
 0xdb3   :  { %v688_v37 = vstv %s687_s26 }
 0xdb4   :  { %1149 = vpow2.f32 %v659_v9  ;;  %v689_v39 = vmul.f32 1.442695, %v688_v37 }
 0xdb5   :  { %1151 = vtanh.f32 %v536_v13 }
 0xdba   :  { %v1150_v10 = vpop.eup %1149 }
 0xdbb   :  { %v661_v11 = vsel %vm573_vm1, %v1150_v10, 0.0  ;;  %v1152_v14 = vpop.eup %1151 }
 0xdbc   :  { %662 = vadd.xlane.f32.xlu0 %v661_v11 }
 0xdd0   :  { %746 = vrot.lane.b32.xlu0 %v1152_v14, %s1204_s4 }
 0xe2f   :  { %v663_v23 = vpop.xlane.xlu0 %662 }
 0xe30   :  { %v664_v24 = vrot.slane %v663_v23, 4 }
 0xe32   :  { %v665_v25 = vadd.f32 %v664_v24, %v663_v23 }
 0xe34   :  { %v666_v26 = vrot.slane %v665_v25, 2 }
 0xe36   :  { %v667_v27 = vadd.f32 %v666_v26, %v665_v25 }
 0xe38   :  { %v668_v28 = vrot.slane %v667_v27, 1 }
 0xe3a   :  { %v669_v29 = vadd.f32 %v668_v28, %v667_v27 }
 0xe3c   :  { %1042 = vpush %v669_v29 }
 0xe42   :  { %v747_v30 = vpop.permute.xlu0 %746 }
 0xe43   :  { %976 = vmatmul.msk.f32.vlgmr.msrb.gmra.mxu3 %vm187_vm8, %v747_v30  ;;  %vm770_vm8 = vcmask 1024  }
 0xe6d   :  { %s1579_s11 = spop %1042 }
 0xe6e   :  { %v671_v32 = vstv %s1579_s11 }
 0xe6f   :  { %1153 = vlog2.f32 %v671_v32 }
 0xe70   :  { %1155 = vpow2.f32 %v677_v33 }
 0xe75   :  { %v1154_v34 = vpop.eup %1153 }
 0xe76   :  { %v673_v35 = vmul.f32 0.6931472, %v1154_v34  ;;  %v1156_v36 = vpop.eup %1155 }
 0xe78   :  { %1044 = vpush %v673_v35 }
 0xe79   :  { %1046 = vpush %v1156_v36 }
 0xea9   :  { %s1583_s9 = spop %1044 }
 0xeaa   :  { %s1047_s7 = spop %1046  ;;  %s675_s8 = sadd.f32 %s1583_s9, %s1576_s25 }
 0xeab   :  { %s680_s19 = smul.f32 %s1047_s7, %s1579_s11 }
 0xead   :  { %s681_s21 = sadd.f32 1.0, %s680_s19 }
 0xeaf   :  { %v682_v38 = vstv %s681_s21 }
 0xeb0   :  { %1157 = vlog2.f32 %v682_v38 }
 0xeb1   :  { %1159 = vpow2.f32 %v689_v39 }
 0xeb6   :  { %v1158_v40 = vpop.eup %1157 }
 0xeb7   :  { %v684_v41 = vmul.f32 0.6931472, %v1158_v40  ;;  %v1160_v42 = vpop.eup %1159 }
 0xeb9   :  { %1048 = vpush %v684_v41 }
 0xeba   :  { %1050 = vpush %v1160_v42 }
 0xec6   :  { %v767_v44 = vpop.f32.mrf.mxu3 }
 0xec7   :  { %v1586_v45 = vadd.f32 %v1100_v43, %v767_v44 }
 0xec9   :  { %v771_v46 = vsel %vm770_vm8, %v1586_v45, 0.0 }
 0xeca   :  { %772 = vadd.xlane.f32.xlu0 %v771_v46 }
 0xeea   :  { %s1049_s10 = spop %1048 }
 0xeeb   :  { %s1051_s23 = spop %1050 }
 0xeec   :  { %s692_s27 = sadd.f32 %s1051_s23, %s1579_s11 }
 0xeee   :  { %v693_v47 = vstv %s692_s27  ;;  %s1209_s27 = smov 128.0  }
 0xeef   :  { %1161 = vlog2.f32 %v693_v47  ;;  %913 = sst [smem:[#allocation5 + $0x2]] %s1209_s27 }
 0xef0   :  { %1163 = vrcp.f32 %v1208_v55  ;;  %933 = sst [smem:[#allocation5 + $0x102]] %s1209_s27 }
 0xef5   :  { %v1162_v48 = vpop.eup %1161 }
 0xef6   :  { %v695_v49 = vmul.f32 0.6931472, %v1162_v48  ;;  %v1164_v58 = vpop.eup %1163 }
 0xef7   :  { %v782_v60 = vmul.f32 2.0, %v1164_v58  ;;  %vm786_vm3 = vweird.f32 %v1164_v58 }
 0xef8   :  { %1052 = vpush %v695_v49 }
 0xef9   :  { %v783_v63 = vsub.f32 1.0, %v782_v60 }
 0xefb   :  { %v784_v2 = vmul.f32 %v1164_v58, %v783_v63 }
 0xefd   :  { %v785_v7 = vadd.f32 %v1164_v58, %v784_v2 }
 0xeff   :  { %v787_v11 = vsel %vm786_vm3, %v1164_v58, %v785_v7 }
 0xf29   :  { %s1053_s28 = spop %1052 }
 0xf2a   :  { %s697_s6 = sadd.f32 %s1053_s28, %s1576_s25 }
 0xf2c   :  { %s1652_s10 = smov (!%p698_p2, %s1049_s10), %s697_s6  ;;  %s1210_s6 = smov 14.0  }
 0xf2d   :  { %s700_s29 = ssub.f32 %s1652_s10, %s675_s8 }
 0xf2e   :  { %925 = sst [smem:[#allocation5 + $0x83]] %s1652_s10 }
 0xf2f   :  { %927 = sst [smem:[#allocation5 + $0x84]] %s700_s29  ;;  %v701_v50 = vstv %s700_s29 }
 0xf30   :  { %v1596_v51 = vmul.f32 %v701_v50, %v1512_v5  ;;  %923 = sst [smem:[#allocation5 + $0x82]] %s1210_s6 }
 0xf32   :  { %vm703_vm2 = vcmp.ne.f32.partialorder %v1596_v51, %v1596_v51 }
 0xf33   :  { %v704_v53 = vsel %vm703_vm2, 1.0, %v1207_v52 }
 0xf34   :  { %v705_v54 = vsel %vm573_vm1, %v704_v53, 0.0 }
 0xf35   :  { %706 = vadd.xlane.f32.xlu1 %v705_v54 }
 0xf3d   :  { %v773_v56 = vpop.xlane.xlu0 %772 }
 0xf3e   :  { %v774_v57 = vrot.slane %v773_v56, 4 }
 0xf40   :  { %v775_v59 = vadd.f32 %v774_v57, %v773_v56 }
 0xf42   :  { %v776_v61 = vrot.slane %v775_v59, 2 }
 0xf44   :  { %v777_v1 = vadd.f32 %v776_v61, %v775_v59 }
 0xf46   :  { %v778_v6 = vrot.slane %v777_v1, 1 }
 0xf48   :  { %v779_v10 = vadd.f32 %v778_v6, %v777_v1 }
 0xfa8   :  { %v707_v62 = vpop.xlane.xlu1 %706 }
 0xfa9   :  { %v708_v5 = vrot.slane %v707_v62, 4 }
 0xfab   :  { %v709_v0 = vadd.f32 %v708_v5, %v707_v62 }
 0xfad   :  { %v710_v3 = vrot.slane %v709_v0, 2 }
 0xfaf   :  { %v711_v4 = vadd.f32 %v710_v3, %v709_v0 }
 0xfb1   :  { %v712_v8 = vrot.slane %v711_v4, 1 }
 0xfb3   :  { %v713_v9 = vadd.f32 %v712_v8, %v711_v4 }
 0xfb5   :  { %1054 = vpush %v713_v9 }
 0xfb6   :  { %1056 = vpush %v779_v10 }
 0xfb7   :  { %1058 = vpush %v787_v11 }
 0xfe6   :  { %s1601_s30 = spop %1054 }
 0xfe7   :  { %s1057_s15 = spop %1056  ;;  %p715_p3 = scmp.gt.f32.partialorder %s1601_s30, 0.0 }
 0xfe8   :  { %s1059_s0 = spop %1058 }
 0xfe9   :  { %s789_s1 = smul.f32 %s1059_s0, %s1057_s15  ;;  %s955_s15 = sshll.u32 %s1646_s14, 4  ;;  %s956_s15 = int_to_ptr.vmem [resolvable:$true] %s955_s15 }
 0xfea   :  { %s716_s4 = scalar_select %p715_p3, 1, 0 }
 0xfeb   :  { %v790_v12 = vstv %s789_s1  ;;  %939 = sst [smem:[#allocation5 + $0x180]] %s789_s1  ;;  %s1211_s0 = smov 2.0  }
 0xfec   :  { %v791_v13 = vsub.f32 %v1586_v45, %v790_v12  ;;  %v717_v48 = vstv %s716_s4  ;;  %943 = sst [smem:[#allocation5 + $0x182]] %s1211_s0  ;;  %s1213_s4 = smov 7  }
 0xfed   :  { %vm718_vm11 = vcmp.eq.s32.totalorder %v717_v48, 1 }
 0xfee   :  { %v792_v14 = vmul.f32 %v791_v13, %v791_v13  ;;  %v719_v50 = vsel %vm718_vm11, 0.5, %v1596_v51 }
 0xfef   :  { %v720_v52 = vsel %vm573_vm1, %v719_v50, -inf }
 0xff0   :  { %v793_v15 = vsel %vm770_vm8, %v792_v14, 0.0 }
 0xff1   :  { %794 = vadd.xlane.f32.xlu2 %v793_v15 }
0x1064   :  { %v795_v16 = vpop.xlane.xlu2 %794 }
0x1065   :  { %v796_v17 = vrot.slane %v795_v16, 4 }
0x1067   :  { %v797_v19 = vadd.f32 %v796_v17, %v795_v16 }
0x1069   :  { %v798_v18 = vrot.slane %v797_v19, 2 }
0x106b   :  { %v799_v20 = vadd.f32 %v798_v18, %v797_v19 }
0x106d   :  { %v800_v21 = vrot.slane %v799_v20, 1 }
0x106f   :  { %v801_v22 = vadd.f32 %v800_v21, %v799_v20 }
0x1071   :  { %1060 = vpush %v801_v22 }
0x10a2   :  { %s1061_s2 = spop %1060 }
0x10a3   :  { %v803_v23 = vstv %s1061_s2  ;;  %s1212_s2 = smov [#allocation5]  }
0x10a4   :  { %1165 = vrcp.f32 %v803_v23  ;;  %v814_v35 = vand.u32 2147483648, %v803_v23  ;;  %vm823_vm5 = vweird.f32 %v803_v23  ;;  %v827_v36 = vand.u32 2147483647, %v803_v23 }
0x10a5   :  { %1167 = vrsqrt.f32 %v803_v23  ;;  %vm811_vm7 = vcmp.eq.f32.partialorder %v803_v23, inf  ;;  %vm813_vm10 = vcmp.eq.f32.partialorder %v803_v23, 0.0 }
0x10a6   :  { %1169 = vlog2.f32 %v803_v23  ;;  %v830_v41 = vor.u32 1.1754944e-38, %v814_v35  ;;  %vm828_vm9 = vcmp.eq.f32.partialorder %v827_v36, 8.507059e+37 }
0x10aa   :  { %v1166_v24 = vpop.eup %1165 }
0x10ab   :  { %v1168_v25 = vpop.eup %1167  ;;  %v819_v26 = vmul.f32 %v1166_v24, %v803_v23  ;;  %vm824_vm4 = vweird.f32 %v1166_v24 }
0x10ac   :  { %v805_v27 = vmul.f32 %v1168_v25, %v803_v23  ;;  %vm825_vm6 = vmor %vm823_vm5, %vm824_vm4  ;;  %v1170_v38 = vpop.eup %1169 }
0x10ad   :  { %v820_v28 = vsub.f32 1.0, %v819_v26  ;;  %v838_v44 = vmul.f32 0.6931472, %v1170_v38 }
0x10ae   :  { %v806_v29 = vmul.f32 %v1168_v25, %v805_v27 }
0x10af   :  { %v821_v30 = vmul.f32 %v1166_v24, %v820_v28 }
0x10b0   :  { %v807_v31 = vmul.f32 0.5, %v806_v29 }
0x10b1   :  { %v822_v33 = vadd.f32 %v1166_v24, %v821_v30 }
0x10b2   :  { %v808_v32 = vsub.f32 1.5, %v807_v31 }
0x10b3   :  { %v826_v39 = vsel %vm825_vm6, %v1166_v24, %v822_v33 }
0x10b4   :  { %v809_v34 = vmul.f32 %v1168_v25, %v808_v32  ;;  %v831_v43 = vsel %vm828_vm9, %v830_v41, %v826_v39 }
0x10b6   :  { %v810_v37 = vmul.f32 %v809_v34, %v803_v23 }
0x10b8   :  { %v812_v40 = vsel %vm811_vm7, %v803_v23, %v810_v37 }
0x10b9   :  { %v815_v42 = vsel %vm813_vm10, %v814_v35, %v812_v40 }
0x10ba   :  { %1062 = vpush %v815_v42 }
0x10bb   :  { %1064 = vpush %v831_v43 }
0x10bc   :  { %1066 = vpush %v838_v44 }
0x10eb   :  { %s1063_s16 = spop %1062 }
0x10ec   :  { %941 = sst [smem:[#allocation5 + $0x181]] %s1063_s16  ;;  %s1065_s17 = spop %1064 }
0x10ed   :  { %s833_s18 = smul.f32 -0.5, %s1065_s17  ;;  %s1067_s5 = spop %1066 }
0x10ee   :  { %s840_s22 = smul.f32 -0.5, %s1067_s5 }
0x10ef   :  { %v834_v46 = vstv %s833_s18 }
0x10f0   :  { %v835_v47 = vmul.f32 %v834_v46, %v792_v14  ;;  %s977_s12 = sadd.f32 -0.9189385, %s840_s22 }
0x10f2   :  { %v842_v49 = vsel %vm770_vm8, %v835_v47, -inf }
0x10f3   :  { %843 = vmax.xlane.f32.xlu1 %v842_v49 }
0x10fb   :  { %721 = vmax.xlane.f32.xlu1 %v720_v52 }
0x1166   :  { %v844_v53 = vpop.xlane.xlu1 %843 }
0x1167   :  { %v845_v54 = vrot.slane %v844_v53, 4 }
0x1169   :  { %v846_v55 = vmax.f32 %v844_v53, %v845_v54 }
0x116b   :  { %v847_v56 = vrot.slane %v846_v55, 2 }
0x116d   :  { %v848_v57 = vmax.f32 %v846_v55, %v847_v56 }
0x116e   :  { %v722_v60 = vpop.xlane.xlu1 %721 }
0x116f   :  { %v849_v58 = vrot.slane %v848_v57, 1  ;;  %v1609_v63 = vsub.f32 %v719_v50, %v722_v60 }
0x1171   :  { %v850_v59 = vmax.f32 %v848_v57, %v849_v58  ;;  %v724_v51 = vmul.f32 1.442695, %v1609_v63 }
0x1173   :  { %1068 = vpush %v850_v59 }
0x11a4   :  { %s1069_s20 = spop %1068 }
0x11a5   :  { %v853_v61 = vstv %s1069_s20  ;;  %s1614_s3 = sadd.f32 %s1069_s20, %s977_s12 }
0x11a6   :  { %v854_v62 = vsub.f32 %v835_v47, %v853_v61 }
0x11a7   :  { %v872_v12 = vstv %s1614_s3  ;;  %s883_s25 = ssub.f32 0.0, %s1614_s3  ;;  %p894_p4 = scmp.lt.f32.partialorder %s1614_s3, 0.0 }
0x11a8   :  { %v855_v5 = vmul.f32 1.442695, %v854_v62  ;;  %v873_v14 = vmul.f32 1.442695, %v872_v12 }
0x11a9   :  { %v884_v19 = vstv %s883_s25 }
0x11aa   :  { %1171 = vpow2.f32 %v855_v5  ;;  %v885_v20 = vmul.f32 1.442695, %v884_v19 }
0x11ab   :  { %1173 = vpow2.f32 %v724_v51 }
0x11b0   :  { %v1172_v0 = vpop.eup %1171 }
0x11b1   :  { %v857_v1 = vsel %vm770_vm8, %v1172_v0, 0.0  ;;  %v1174_v2 = vpop.eup %1173 }
0x11b2   :  { %858 = vadd.xlane.f32.xlu2 %v857_v1  ;;  %v726_v3 = vsel %vm573_vm1, %v1174_v2, 0.0  ;;  %vm903_vm1 = vcmask 56320  }
0x11ba   :  { %727 = vadd.xlane.f32.xlu2 %v726_v3 }
0x1225   :  { %v859_v4 = vpop.xlane.xlu2 %858 }
0x1226   :  { %v860_v6 = vrot.slane %v859_v4, 4 }
0x1228   :  { %v861_v7 = vadd.f32 %v860_v6, %v859_v4 }
0x122a   :  { %v862_v8 = vrot.slane %v861_v7, 2 }
0x122c   :  { %v863_v9 = vadd.f32 %v862_v8, %v861_v7 }
0x122d   :  { %v728_v29 = vpop.xlane.xlu2 %727 }
0x122e   :  { %v864_v10 = vrot.slane %v863_v9, 1 }
0x1230   :  { %v865_v11 = vadd.f32 %v864_v10, %v863_v9 }
0x1232   :  { %1070 = vpush %v865_v11 }
0x1263   :  { %s1071_s24 = spop %1070 }
0x1264   :  { %v867_v13 = vstv %s1071_s24 }
0x1265   :  { %1175 = vlog2.f32 %v867_v13 }
0x1266   :  { %1177 = vpow2.f32 %v873_v14 }
0x126b   :  { %v1176_v15 = vpop.eup %1175 }
0x126c   :  { %v869_v16 = vmul.f32 0.6931472, %v1176_v15  ;;  %v1178_v17 = vpop.eup %1177 }
0x126e   :  { %1072 = vpush %v869_v16 }
0x126f   :  { %1074 = vpush %v1178_v17 }
0x129f   :  { %s1618_s11 = spop %1072 }
0x12a0   :  { %s1075_s26 = spop %1074  ;;  %s871_s23 = sadd.f32 %s1618_s11, %s1614_s3 }
0x12a1   :  { %s876_s9 = smul.f32 %s1075_s26, %s1071_s24 }
0x12a3   :  { %s877_s7 = sadd.f32 1.0, %s876_s9 }
0x12a5   :  { %v878_v18 = vstv %s877_s7 }
0x12a6   :  { %1179 = vlog2.f32 %v878_v18 }
0x12a7   :  { %1181 = vpow2.f32 %v885_v20 }
0x12ac   :  { %v1180_v21 = vpop.eup %1179 }
0x12ad   :  { %v880_v22 = vmul.f32 0.6931472, %v1180_v21  ;;  %v1182_v23 = vpop.eup %1181 }
0x12af   :  { %1076 = vpush %v880_v22 }
0x12b0   :  { %1078 = vpush %v1182_v23 }
0x12e0   :  { %s1077_s19 = spop %1076 }
0x12e1   :  { %s1079_s21 = spop %1078 }
0x12e2   :  { %s888_s10 = sadd.f32 %s1079_s21, %s1071_s24 }
0x12e4   :  { %v889_v24 = vstv %s888_s10 }
0x12e5   :  { %1183 = vlog2.f32 %v889_v24 }
0x12e6   :  { %1185 = vlog2.f32 %v728_v29 }
0x12eb   :  { %v1184_v25 = vpop.eup %1183 }
0x12ec   :  { %v891_v26 = vmul.f32 0.6931472, %v1184_v25  ;;  %v1186_v30 = vpop.eup %1185 }
0x12ed   :  { %v730_v31 = vmul.f32 0.6931472, %v1186_v30 }
0x12ee   :  { %1080 = vpush %v891_v26 }
0x12ef   :  { %v731_v32 = vsub.f32 %v1609_v63, %v730_v31 }
0x131f   :  { %s1081_s28 = spop %1080 }
0x1320   :  { %s893_s8 = sadd.f32 %s1081_s28, %s1614_s3 }
0x1322   :  { %s1654_s19 = smov (!%p894_p4, %s1077_s19), %s893_s8 }
0x1323   :  { %945 = sst [smem:[#allocation5 + $0x183]] %s1654_s19 }
0x1324   :  { %s896_s1 = ssub.f32 %s1654_s19, %s871_s23 }
0x1326   :  { %v897_v27 = vstv %s896_s1  ;;  %947 = sst [smem:[#allocation5 + $0x184]] %s896_s1 }
0x1327   :  { %v898_v28 = vmul.f32 %v897_v27, %v1586_v45  ;;  %958 = dma.smem_to_vmem %s1212_s2, 64, %s956_s15, [#allocation6]  }
0x1329   :  { %900 = vrot.lane.b32.xlu1 %v898_v28, %s1213_s4 }
0x139b   :  { %v901_v33 = vpop.permute.xlu1 %900 }
0x139c   :  { %v904_v34 = vsel %vm903_vm1, %v731_v32, %v901_v33 }
0x139d   :  { %v906_v35 = vsel %vm905_vm12, %v904_v34, 0.0 }
0x139e   :  { %907 = vst [vmem:[%s1645_s13] sm:$0x3] %v906_v35 }
0x139f   :  { %1199 = dma.done.wait [#allocation6], 64  }
0x13a0   :  { %1200 = vsyncadd [#allocation6], 4294967232 }
0x13a1   :  { %965 = sfence }
0x13a2   :  { %966 = vsyncpa [#allocation6], 1 }

</bundles_post_ra>
